<compile_context>
chip_gen: v6e
topology: v6e:2x2x1
jax: 0.10.0
libtpu: 0.0.40
codegen_flags: <defaults>
</compile_context>

<pallas_src>
import functools

import jax
import jax.numpy as jnp
from jax import lax
from jax.experimental import pallas as pl
from jax.experimental.pallas import tpu as pltpu


# ---------------------------------------------------------------------------
# Pallas kernel
# ---------------------------------------------------------------------------
def _sca_kernel(q_ref, val_ref, rxy_ref, a_ref, wo_ref, bo_ref, o_ref, acc_sc,
                *, bev_d, n_heads, img_h, img_w):
    """One (batch, bev-token-tile, view) grid step; views accumulate in VMEM.

    q_ref   : (C, tile_n)                f32   query tokens (resident per (b,t))
    val_ref : (nv, C, H*W)               bf16  value-projected images, resident per batch
    rxy_ref : (2*bev_d, tile_n)          f32   pixel coords, x rows then y rows
    a_ref   : (bev_d*n_heads, tile_n)    bf16  per-(depth, head) softmax weights
    wo_ref  : (C, C)                     bf16  output projection (transposed)
    bo_ref  : (C, 1)                     f32   output bias
    o_ref   : (C, tile_n)                f32   lane-dense output
    acc_sc  : (C, tile_n)                f32   cross-view accumulator (VMEM)
    """
    v = pl.program_id(2)
    nv = pl.num_programs(2)
    C, tile_n = acc_sc.shape
    head_dim = C // n_heads
    hw = img_h * img_w

    # value-projected features of the current view (dynamic first-axis index)
    val = val_ref[v]                                             # (C, H*W) bf16

    # constant pixel grids, hoisted out of the depth loop (JAX does not CSE them)
    xgrid = lax.broadcasted_iota(jnp.int32, (img_w, tile_n), 0).astype(jnp.float32)
    ygrid = lax.broadcasted_iota(jnp.int32, (img_h, tile_n), 0).astype(jnp.float32)

    # Depth loop accumulates into a local f32 value; acc_sc is touched once per
    # view.  bev_d is tiny and per-depth intermediates are small -> static unroll.
    acc = jnp.zeros((n_heads, head_dim, tile_n), jnp.float32)
    for d in range(bev_d):
        rx = rxy_ref[d:d + 1, :]                                 # (1, tile_n) pixel x
        ry = rxy_ref[bev_d + d:bev_d + d + 1, :]                 # (1, tile_n) pixel y
        # bilinear tent weights (zeros padding, align_corners=True)
        wx = jnp.maximum(1.0 - jnp.abs(rx - xgrid), 0.0)         # (W, tile_n)
        wy = jnp.maximum(1.0 - jnp.abs(ry - ygrid), 0.0)         # (H, tile_n)
        # full bilinear weight as an outer product -> single K=H*W MXU matmul
        w_full = (wy[:, None, :] * wx[None, :, :]).reshape(hw, tile_n)
        samp = jnp.dot(val, w_full.astype(jnp.bfloat16),
                       preferred_element_type=jnp.float32)       # (C, tile_n)
        # per-(depth, head) attention weight, broadcast over head_dim channels
        a_d = a_ref[d * n_heads:(d + 1) * n_heads, :].astype(jnp.float32)  # (n_heads, tile_n)
        acc = acc + a_d[:, None, :] * samp.reshape(n_heads, head_dim, tile_n)

    @pl.when(v == 0)
    def _():
        acc_sc[...] = acc.reshape(C, tile_n)

    @pl.when(v > 0)
    def _():
        acc_sc[...] += acc.reshape(C, tile_n)

    @pl.when(v == nv - 1)
    def _():
        out = jnp.dot(wo_ref[...], acc_sc[...].astype(jnp.bfloat16),
                      preferred_element_type=jnp.float32)        # (C, tile_n)
        # lane-dense (C, tile_n) store; bias + residual kept in f32
        o_ref[...] = (out + bo_ref[...] + q_ref[...]).astype(o_ref.dtype)


def _pick_tile_n(n_bev, bs):
    """Prefer large lane-dense tiles, but keep >=4 parallel grid units (v7x 2 TCs)."""
    for cand in (2048, 1024, 512, 256, 128):
        if n_bev % cand == 0:
            if bs * (n_bev // cand) >= 4 or cand == 128:
                return cand
    raise ValueError("BEV token count must be a multiple of 128 (see TODO)")


# ---------------------------------------------------------------------------
# Wrapper (layout plumbing + attention / value-projection precompute)
# ---------------------------------------------------------------------------
def spatial_cross_attn(query, img_feat, reference_points, params, *, n_heads):
    """
    query:             (bs, C, bev_h, bev_w)
    img_feat:          (bs, n_views, C_in, H, W)
    reference_points:  (bs, n_views, bev_h, bev_w*bev_d, 2)   in [-1, 1]
    returns:           (bs, C, bev_h, bev_w)
    """
    bs, C, bev_h, bev_w = query.shape
    _, nv, c_in, H, W = img_feat.shape
    n_bev = bev_h * bev_w
    bev_d = reference_points.shape[3] // bev_w
    hw = H * W
    assert C % n_heads == 0
    assert n_bev % 128 == 0, "BEV token count must be lane aligned (see TODO)"

    w_value, w_attn, b_attn, w_out, b_out = params

    tile_n = _pick_tile_n(n_bev, bs)
    n_t = n_bev // tile_n

    # ---- lane-dense, channels-major query tokens: flattened NCHW, no transpose
    q_tok = query.reshape(bs, C, n_bev).astype(jnp.float32)          # (bs, C, N_bev)

    # ---- per-(view, head) attention softmax over depth bins, bf16, depth-major rows
    # TODO(synk): could be fused into the kernel (w_attn[v] matmul + EUP exp) to
    # remove this HBM stream entirely.
    logits = jnp.einsum('bcq,vcm->bvqm', q_tok, w_attn) + b_attn[None]   # (bs,nv,N_bev,H*D)
    attn = jax.nn.softmax(
        logits.reshape(bs, nv, n_bev, n_heads, bev_d), axis=-1)          # per-head max inside
    a_all = jnp.transpose(attn, (0, 1, 4, 3, 2))                         # (bs,nv,bev_d,n_heads,N_bev)
    a_all = a_all.reshape(bs, nv, bev_d * n_heads, n_bev).astype(jnp.bfloat16)

    # ---- value-projected image features, (bs, nv, C, H*W), bf16 (f32 projection)
    val = jnp.einsum('bvkhw,kc->bvchw', img_feat.astype(jnp.float32), w_value)
    val = val.reshape(bs, nv, C, hw).astype(jnp.bfloat16)

    # ---- reference points -> pixel coordinates, depth-major rows, lane-dense
    rp = reference_points.reshape(bs, nv, bev_h, bev_w, bev_d, 2)
    rp = jnp.transpose(rp, (0, 1, 4, 2, 3, 5)).reshape(bs, nv, bev_d, n_bev, 2)
    rx = (rp[..., 0] + 1.0) * 0.5 * (W - 1)                              # align_corners=True
    ry = (rp[..., 1] + 1.0) * 0.5 * (H - 1)
    rxy = jnp.concatenate([rx, ry], axis=2).astype(jnp.float32)          # (bs,nv,2*bev_d,N_bev)

    wo_t = w_out.T.astype(jnp.bfloat16)                                  # (C, C)
    bo_t = b_out.reshape(C, 1).astype(jnp.float32)                       # (C, 1)

    kernel = functools.partial(_sca_kernel, bev_d=bev_d, n_heads=n_heads,
                               img_h=H, img_w=W)

    out = pl.pallas_call(
        kernel,
        out_shape=jax.ShapeDtypeStruct((bs, C, n_bev), jnp.float32),
        grid_spec=pltpu.PrefetchScalarGridSpec(
            num_scalar_prefetch=0,
            grid=(bs, n_t, nv),                      # views last (reduction axis)
            in_specs=[
                # query tokens: resident across views of one (b, t)
                pl.BlockSpec((None, C, tile_n), lambda b, t, v: (b, 0, t)),
                # value-projected images: ALL views resident, DMA'd once per batch
                # TODO(synk): for production feature maps check nv*C*H*W*2B fits
                # the v7x 64 MiB VMEM budget; otherwise block per view.
                pl.BlockSpec((None, nv, C, hw), lambda b, t, v: (b, 0, 0, 0)),
                # pixel coords (x rows | y rows)
                pl.BlockSpec((None, None, 2 * bev_d, tile_n), lambda b, t, v: (b, v, 0, t)),
                # per-(depth, head) attention weights, bf16
                pl.BlockSpec((None, None, bev_d * n_heads, tile_n), lambda b, t, v: (b, v, 0, t)),
                pl.BlockSpec((C, C), lambda b, t, v: (0, 0)),            # W_out^T
                pl.BlockSpec((C, 1), lambda b, t, v: (0, 0)),            # b_out^T
            ],
            out_specs=pl.BlockSpec((None, C, tile_n), lambda b, t, v: (b, 0, t)),
            scratch_shapes=[pltpu.VMEM((C, tile_n), jnp.float32)],
        ),
        compiler_params=pltpu.CompilerParams(
            dimension_semantics=("parallel", "parallel", "arbitrary"),
            vmem_limit_bytes=32 * 1024 * 1024),
    )(q_tok, val, rxy, a_all, wo_t, bo_t)

    return out.reshape(bs, C, bev_h, bev_w)          # channels-major already: reshape only


# ---------------------------------------------------------------------------
# Pure-JAX reference (f32) for correctness checking
# ---------------------------------------------------------------------------
def _spatial_cross_attn_ref(query, img_feat, reference_points, params, *, n_heads):
    bs, C, bev_h, bev_w = query.shape
    _, nv, c_in, H, W = img_feat.shape
    n_bev = bev_h * bev_w
    bev_d = reference_points.shape[3] // bev_w
    head_dim = C // n_heads
    w_value, w_attn, b_attn, w_out, b_out = params

    q_tok = jnp.transpose(query.reshape(bs, C, n_bev), (0, 2, 1))        # (bs, N_bev, C)
    logits = jnp.einsum('bqc,vcm->bvqm', q_tok, w_attn) + b_attn[None]
    attn = jax.nn.softmax(logits.reshape(bs, nv, n_bev, n_heads, bev_d), axis=-1)

    val = jnp.einsum('bvkhw,kc->bvhwc', img_feat, w_value)               # (bs,nv,H,W,C)

    rp = reference_points.reshape(bs, nv, bev_h, bev_w, bev_d, 2)
    rp = jnp.transpose(rp, (0, 1, 4, 2, 3, 5)).reshape(bs, nv, bev_d, n_bev, 2)
    rx = (rp[..., 0] + 1.0) * 0.5 * (W - 1)
    ry = (rp[..., 1] + 1.0) * 0.5 * (H - 1)
    xs = jnp.arange(W, dtype=jnp.float32)
    ys = jnp.arange(H, dtype=jnp.float32)
    wx = jnp.maximum(1.0 - jnp.abs(rx[..., None] - xs), 0.0)             # (bs,nv,d,N_bev,W)
    wy = jnp.maximum(1.0 - jnp.abs(ry[..., None] - ys), 0.0)             # (bs,nv,d,N_bev,H)
    sampled = jnp.einsum('bvdqh,bvdqw,bvhwc->bvdqc', wy, wx, val)        # (bs,nv,d,N_bev,C)

    a = jnp.repeat(jnp.transpose(attn, (0, 1, 4, 2, 3)), head_dim, axis=-1)
    acc = jnp.sum(a * sampled, axis=(1, 2))                              # (bs, N_bev, C)
    out = acc @ w_out + b_out + q_tok
    return jnp.transpose(out, (0, 2, 1)).reshape(bs, C, bev_h, bev_w)


# ---------------------------------------------------------------------------
# sample_3d_points + synthetic BEV->camera projector (plain-JAX glue)
# ---------------------------------------------------------------------------
def sample_3d_points(bev_bound, bev_feat_shape, bev_depth_dim, z_shift):
    bev_h = bev_feat_shape // 2
    bev_w = bev_feat_shape
    x_shift = bev_bound['X'] / bev_feat_shape
    y_shift = bev_bound['Y'] / bev_feat_shape
    z_sh = bev_bound['Z'] / bev_depth_dim
    xs = x_shift + 2.0 * x_shift * jnp.arange(bev_h, dtype=jnp.float32)
    ys = -bev_bound['Y'] + y_shift + 2.0 * y_shift * jnp.arange(bev_w, dtype=jnp.float32)
    zs = (-bev_bound['Z'] + z_sh + z_shift
          + 2.0 * z_sh * jnp.arange(bev_depth_dim, dtype=jnp.float32))
    X, Y = jnp.meshgrid(xs, ys, indexing='ij')                    # (h, w)
    X = jnp.broadcast_to(X[..., None], (bev_h, bev_w, bev_depth_dim))
    Y = jnp.broadcast_to(Y[..., None], (bev_h, bev_w, bev_depth_dim))
    Z = jnp.broadcast_to(zs[None, None, :], (bev_h, bev_w, bev_depth_dim))
    return jnp.stack([X, Y, Z], axis=-1)                          # (h, w, d, 3)


def bev_grid_to_camera(points3d, n_views, vehicle_type_idx):
    """Synthetic deterministic projector -> (n_views, 2, h, w, d) in [-1, 1]."""
    x, y, z = points3d[..., 0], points3d[..., 1], points3d[..., 2]
    ang = (2.0 * jnp.pi * jnp.arange(n_views, dtype=jnp.float32) / n_views
           + 0.05 * vehicle_type_idx)
    ca = jnp.cos(ang)[:, None, None, None]
    sa = jnp.sin(ang)[:, None, None, None]
    xc = ca * x[None] - sa * y[None]
    yc = sa * x[None] + ca * y[None]
    cam_h = 1.2 + 0.1 * vehicle_type_idx
    u = jnp.tanh(yc / (jnp.abs(xc) + 1.0))
    v = jnp.tanh((z[None] - cam_h) / (jnp.abs(xc) + 1.0))
    return jnp.stack([u, v], axis=1)                              # (v, 2, h, w, d)


def init_params(key, dim_embed, n_heads, bev_d, n_views):
    hd = n_heads * bev_d
    k1, k2, k3, k4 = jax.random.split(key, 4)
    scale = 1.0 / jnp.sqrt(dim_embed)
    w_value = scale * jax.random.normal(k1, (dim_embed, dim_embed), jnp.float32)
    w_attn = scale * jax.random.normal(k2, (n_views, dim_embed, hd), jnp.float32)
    b_attn = jnp.zeros((n_views, 1, hd), jnp.float32)
    w_out = scale * jax.random.normal(k3, (dim_embed, dim_embed), jnp.float32)
    b_out = 0.01 * jax.random.normal(k4, (1, dim_embed), jnp.float32)
    return (w_value, w_attn, b_attn, w_out, b_out)


# ---------------------------------------------------------------------------
# Full module forward (mirrors SpatialCrossAttn.forward)
# ---------------------------------------------------------------------------
def _build_reference_points(vehicle_type_idx, *, bev_bound, bev_feat_shape,
                            bev_depth_dim, z_shift, n_views, batch_size):
    pts3d = sample_3d_points(bev_bound, bev_feat_shape, bev_depth_dim, z_shift)
    ref = bev_grid_to_camera(pts3d, n_views, vehicle_type_idx)     # (v, 2, h, w, d)
    v, _, h, w, d = ref.shape
    # 'v n h w d -> b v h (w d) n'
    ref = jnp.transpose(ref, (0, 2, 3, 4, 1)).reshape(v, h, w * d, 2)
    return jnp.broadcast_to(ref[None], (batch_size, v, h, w * d, 2))


def spatial_cross_attn_forward(query, img_feat, vehicle_type_idx, params, *,
                               bev_bound, bev_feat_shape, bev_depth_dim,
                               z_shift, n_views, n_heads, batch_size):
    ref = _build_reference_points(
        vehicle_type_idx, bev_bound=bev_bound, bev_feat_shape=bev_feat_shape,
        bev_depth_dim=bev_depth_dim, z_shift=z_shift, n_views=n_views,
        batch_size=batch_size)
    out = spatial_cross_attn(query, img_feat, ref, params, n_heads=n_heads)
    wandb_log_dict = {}
    return out, wandb_log_dict


if __name__ == "__main__":
    # small, consistent shapes
    batch_size = 2
    n_views = 3
    dim_embed = 32
    n_heads = 4
    n_groups = 2          # unused (offset network not reproducible, see TODO)
    bev_feat_shape = 16   # -> bev_h = 8, bev_w = 16  (N_bev = 128, lane aligned)
    bev_depth_dim = 4
    z_shift = 0.5
    bev_bound = {'X': 8.0, 'Y': 8.0, 'Z': 2.0}
    img_h = img_w = 16
    bev_h, bev_w = bev_feat_shape // 2, bev_feat_shape

    key = jax.random.PRNGKey(0)
    kq, kf, kp = jax.random.split(key, 3)
    query = jax.random.normal(kq, (batch_size, dim_embed, bev_h, bev_w), jnp.float32)
    img_feat = jax.random.normal(
        kf, (batch_size, n_views, dim_embed, img_h, img_w), jnp.float32)
    params = init_params(kp, dim_embed, n_heads, bev_depth_dim, n_views)
    vehicle_type_idx = 2

    out, _ = spatial_cross_attn_forward(
        query, img_feat, vehicle_type_idx, params,
        bev_bound=bev_bound, bev_feat_shape=bev_feat_shape,
        bev_depth_dim=bev_depth_dim, z_shift=z_shift, n_views=n_views,
        n_heads=n_heads, batch_size=batch_size)
    out = jax.block_until_ready(out)

    assert out.shape == (batch_size, dim_embed, bev_h, bev_w)
    assert bool(jnp.all(jnp.isfinite(out)))

    # pure f32 JAX reference check (kernel uses bf16 MXU operands / bf16 attn
    # weights -> loose absolute tolerance; outputs are O(10))
    ref_pts = _build_reference_points(
        vehicle_type_idx, bev_bound=bev_bound, bev_feat_shape=bev_feat_shape,
        bev_depth_dim=bev_depth_dim, z_shift=z_shift, n_views=n_views,
        batch_size=batch_size)
    out_ref = _spatial_cross_attn_ref(query, img_feat, ref_pts, params,
                                      n_heads=n_heads)
    max_err = float(jnp.max(jnp.abs(out - out_ref)))
    assert max_err < 0.5, f"kernel/reference mismatch: max abs err = {max_err}"

    print("KERNEL_OK")
</pallas_src>

<mosaic_0001>
module attributes {stable_mosaic.version = 11 : i64} {
  func.func @_sca_kernel(%arg0: i32, %arg1: i32, %arg2: i32, %arg3: memref<1x32x128xf32, #tpu.memory_space<vmem>>, %arg4: memref<1x3x32x256xbf16, #tpu.memory_space<vmem>>, %arg5: memref<1x1x8x128xf32, #tpu.memory_space<vmem>>, %arg6: memref<1x1x16x128xbf16, #tpu.memory_space<vmem>>, %arg7: memref<32x32xbf16, #tpu.memory_space<vmem>>, %arg8: memref<32x1xf32, #tpu.memory_space<vmem>>, %arg9: memref<1x32x128xf32, #tpu.memory_space<vmem>>, %arg10: memref<32x128xf32, #tpu.memory_space<vmem>>) attributes {dimension_semantics = [#tpu.dimension_semantics<parallel>, #tpu.dimension_semantics<parallel>, #tpu.dimension_semantics<arbitrary>], iteration_bounds = array<i64: 2, 1, 3>, scalar_prefetch = 0 : i64, scratch_operands = 1 : i64, tpu.core_type = #tpu.core_type<tc>, window_params = [{transform_indices = @transform_0, window_bounds = array<i64: 1, 32, 128>}, {transform_indices = @transform_1, window_bounds = array<i64: 1, 3, 32, 256>}, {transform_indices = @transform_2, window_bounds = array<i64: 1, 1, 8, 128>}, {transform_indices = @transform_3, window_bounds = array<i64: 1, 1, 16, 128>}, {pipeline_mode = #tpu.pipeline_mode<synchronous>, transform_indices = @transform_4, window_bounds = array<i64: 32, 32>}, {pipeline_mode = #tpu.pipeline_mode<synchronous>, transform_indices = @transform_5, window_bounds = array<i64: 32, 1>}, {transform_indices = @transform_6, window_bounds = array<i64: 1, 32, 128>}]} {
    %c0 = arith.constant 0 : index
    %0 = arith.index_cast %arg2 : i32 to index
    %c0_0 = arith.constant 0 : index
    %c0_1 = arith.constant 0 : index
    %1 = vector.load %arg4[%c0, %0, %c0_0, %c0_1] : memref<1x3x32x256xbf16, #tpu.memory_space<vmem>>, vector<1x1x32x256xbf16>
    %2 = vector.shape_cast %1 : vector<1x1x32x256xbf16> to vector<32x256xbf16>
    %3 = tpu.iota {dimensions = array<i32: 0>} : vector<16x128xi32>
    %4 = arith.sitofp %3 : vector<16x128xi32> to vector<16x128xf32>
    %5 = tpu.iota {dimensions = array<i32: 0>} : vector<16x128xi32>
    %6 = arith.sitofp %5 : vector<16x128xi32> to vector<16x128xf32>
    %cst = arith.constant 0.000000e+00 : f32
    %7 = vector.broadcast %cst : f32 to vector<4x8x128xf32>
    %c0_2 = arith.constant 0 : index
    %c0_3 = arith.constant 0 : index
    %c0_4 = arith.constant 0 : index
    %c0_5 = arith.constant 0 : index
    %8 = vector.load %arg5[%c0_2, %c0_3, %c0_4, %c0_5] : memref<1x1x8x128xf32, #tpu.memory_space<vmem>>, vector<1x1x1x128xf32>
    %9 = vector.shape_cast %8 : vector<1x1x1x128xf32> to vector<1x128xf32>
    %c0_6 = arith.constant 0 : index
    %c0_7 = arith.constant 0 : index
    %c4 = arith.constant 4 : index
    %c0_8 = arith.constant 0 : index
    %10 = vector.load %arg5[%c0_6, %c0_7, %c4, %c0_8] : memref<1x1x8x128xf32, #tpu.memory_space<vmem>>, vector<1x1x1x128xf32>
    %11 = vector.shape_cast %10 : vector<1x1x1x128xf32> to vector<1x128xf32>
    %12 = vector.broadcast %9 : vector<1x128xf32> to vector<16x128xf32>
    %13 = arith.subf %12, %4 : vector<16x128xf32>
    %14 = math.absf %13 : vector<16x128xf32>
    %cst_9 = arith.constant 1.000000e+00 : f32
    %15 = vector.broadcast %cst_9 : f32 to vector<16x128xf32>
    %16 = arith.subf %15, %14 : vector<16x128xf32>
    %cst_10 = arith.constant 0.000000e+00 : f32
    %17 = vector.broadcast %cst_10 : f32 to vector<16x128xf32>
    %18 = arith.maximumf %16, %17 : vector<16x128xf32>
    %19 = vector.broadcast %11 : vector<1x128xf32> to vector<16x128xf32>
    %20 = arith.subf %19, %6 : vector<16x128xf32>
    %21 = math.absf %20 : vector<16x128xf32>
    %cst_11 = arith.constant 1.000000e+00 : f32
    %22 = vector.broadcast %cst_11 : f32 to vector<16x128xf32>
    %23 = arith.subf %22, %21 : vector<16x128xf32>
    %cst_12 = arith.constant 0.000000e+00 : f32
    %24 = vector.broadcast %cst_12 : f32 to vector<16x128xf32>
    %25 = arith.maximumf %23, %24 : vector<16x128xf32>
    %26 = vector.shape_cast %25 : vector<16x128xf32> to vector<16x1x128xf32>
    %27 = vector.shape_cast %18 : vector<16x128xf32> to vector<1x16x128xf32>
    %28 = vector.broadcast %26 : vector<16x1x128xf32> to vector<16x16x128xf32>
    %29 = vector.broadcast %27 : vector<1x16x128xf32> to vector<16x16x128xf32>
    %30 = arith.mulf %28, %29 : vector<16x16x128xf32>
    %31 = vector.shape_cast %30 : vector<16x16x128xf32> to vector<256x128xf32>
    %32 = arith.truncf %31 : vector<256x128xf32> to vector<256x128xbf16>
    %cst_13 = arith.constant dense<0.000000e+00> : vector<32x128xf32>
    %33 = tpu.matmul %2, %32, %cst_13 {dimension_numbers = #tpu.dot_dimension_numbers<[1], [0], [0], [1], [0, 0, 1, 1], [], []>} : vector<32x256xbf16>, vector<256x128xbf16>, vector<32x128xf32> -> vector<32x128xf32>
    %c0_14 = arith.constant 0 : index
    %c0_15 = arith.constant 0 : index
    %c0_16 = arith.constant 0 : index
    %c0_17 = arith.constant 0 : index
    %34 = vector.load %arg6[%c0_14, %c0_15, %c0_16, %c0_17] : memref<1x1x16x128xbf16, #tpu.memory_space<vmem>>, vector<1x1x4x128xbf16>
    %35 = vector.shape_cast %34 : vector<1x1x4x128xbf16> to vector<4x128xbf16>
    %36 = arith.extf %35 : vector<4x128xbf16> to vector<4x128xf32>
    %37 = vector.shape_cast %36 : vector<4x128xf32> to vector<4x1x128xf32>
    %38 = vector.shape_cast %33 : vector<32x128xf32> to vector<4x8x128xf32>
    %39 = vector.broadcast %37 : vector<4x1x128xf32> to vector<4x8x128xf32>
    %40 = arith.mulf %39, %38 : vector<4x8x128xf32>
    %41 = arith.addf %7, %40 : vector<4x8x128xf32>
    %c0_18 = arith.constant 0 : index
    %c0_19 = arith.constant 0 : index
    %c1 = arith.constant 1 : index
    %c0_20 = arith.constant 0 : index
    %42 = vector.load %arg5[%c0_18, %c0_19, %c1, %c0_20] : memref<1x1x8x128xf32, #tpu.memory_space<vmem>>, vector<1x1x1x128xf32>
    %43 = vector.shape_cast %42 : vector<1x1x1x128xf32> to vector<1x128xf32>
    %c0_21 = arith.constant 0 : index
    %c0_22 = arith.constant 0 : index
    %c5 = arith.constant 5 : index
    %c0_23 = arith.constant 0 : index
    %44 = vector.load %arg5[%c0_21, %c0_22, %c5, %c0_23] : memref<1x1x8x128xf32, #tpu.memory_space<vmem>>, vector<1x1x1x128xf32>
    %45 = vector.shape_cast %44 : vector<1x1x1x128xf32> to vector<1x128xf32>
    %46 = vector.broadcast %43 : vector<1x128xf32> to vector<16x128xf32>
    %47 = arith.subf %46, %4 : vector<16x128xf32>
    %48 = math.absf %47 : vector<16x128xf32>
    %cst_24 = arith.constant 1.000000e+00 : f32
    %49 = vector.broadcast %cst_24 : f32 to vector<16x128xf32>
    %50 = arith.subf %49, %48 : vector<16x128xf32>
    %cst_25 = arith.constant 0.000000e+00 : f32
    %51 = vector.broadcast %cst_25 : f32 to vector<16x128xf32>
    %52 = arith.maximumf %50, %51 : vector<16x128xf32>
    %53 = vector.broadcast %45 : vector<1x128xf32> to vector<16x128xf32>
    %54 = arith.subf %53, %6 : vector<16x128xf32>
    %55 = math.absf %54 : vector<16x128xf32>
    %cst_26 = arith.constant 1.000000e+00 : f32
    %56 = vector.broadcast %cst_26 : f32 to vector<16x128xf32>
    %57 = arith.subf %56, %55 : vector<16x128xf32>
    %cst_27 = arith.constant 0.000000e+00 : f32
    %58 = vector.broadcast %cst_27 : f32 to vector<16x128xf32>
    %59 = arith.maximumf %57, %58 : vector<16x128xf32>
    %60 = vector.shape_cast %59 : vector<16x128xf32> to vector<16x1x128xf32>
    %61 = vector.shape_cast %52 : vector<16x128xf32> to vector<1x16x128xf32>
    %62 = vector.broadcast %60 : vector<16x1x128xf32> to vector<16x16x128xf32>
    %63 = vector.broadcast %61 : vector<1x16x128xf32> to vector<16x16x128xf32>
    %64 = arith.mulf %62, %63 : vector<16x16x128xf32>
    %65 = vector.shape_cast %64 : vector<16x16x128xf32> to vector<256x128xf32>
    %66 = arith.truncf %65 : vector<256x128xf32> to vector<256x128xbf16>
    %cst_28 = arith.constant dense<0.000000e+00> : vector<32x128xf32>
    %67 = tpu.matmul %2, %66, %cst_28 {dimension_numbers = #tpu.dot_dimension_numbers<[1], [0], [0], [1], [0, 0, 1, 1], [], []>} : vector<32x256xbf16>, vector<256x128xbf16>, vector<32x128xf32> -> vector<32x128xf32>
    %c0_29 = arith.constant 0 : index
    %c0_30 = arith.constant 0 : index
    %c4_31 = arith.constant 4 : index
    %c0_32 = arith.constant 0 : index
    %68 = vector.load %arg6[%c0_29, %c0_30, %c4_31, %c0_32] : memref<1x1x16x128xbf16, #tpu.memory_space<vmem>>, vector<1x1x4x128xbf16>
    %69 = vector.shape_cast %68 : vector<1x1x4x128xbf16> to vector<4x128xbf16>
    %70 = arith.extf %69 : vector<4x128xbf16> to vector<4x128xf32>
    %71 = vector.shape_cast %70 : vector<4x128xf32> to vector<4x1x128xf32>
    %72 = vector.shape_cast %67 : vector<32x128xf32> to vector<4x8x128xf32>
    %73 = vector.broadcast %71 : vector<4x1x128xf32> to vector<4x8x128xf32>
    %74 = arith.mulf %73, %72 : vector<4x8x128xf32>
    %75 = arith.addf %41, %74 : vector<4x8x128xf32>
    %c0_33 = arith.constant 0 : index
    %c0_34 = arith.constant 0 : index
    %c2 = arith.constant 2 : index
    %c0_35 = arith.constant 0 : index
    %76 = vector.load %arg5[%c0_33, %c0_34, %c2, %c0_35] : memref<1x1x8x128xf32, #tpu.memory_space<vmem>>, vector<1x1x1x128xf32>
    %77 = vector.shape_cast %76 : vector<1x1x1x128xf32> to vector<1x128xf32>
    %c0_36 = arith.constant 0 : index
    %c0_37 = arith.constant 0 : index
    %c6 = arith.constant 6 : index
    %c0_38 = arith.constant 0 : index
    %78 = vector.load %arg5[%c0_36, %c0_37, %c6, %c0_38] : memref<1x1x8x128xf32, #tpu.memory_space<vmem>>, vector<1x1x1x128xf32>
    %79 = vector.shape_cast %78 : vector<1x1x1x128xf32> to vector<1x128xf32>
    %80 = vector.broadcast %77 : vector<1x128xf32> to vector<16x128xf32>
    %81 = arith.subf %80, %4 : vector<16x128xf32>
    %82 = math.absf %81 : vector<16x128xf32>
    %cst_39 = arith.constant 1.000000e+00 : f32
    %83 = vector.broadcast %cst_39 : f32 to vector<16x128xf32>
    %84 = arith.subf %83, %82 : vector<16x128xf32>
    %cst_40 = arith.constant 0.000000e+00 : f32
    %85 = vector.broadcast %cst_40 : f32 to vector<16x128xf32>
    %86 = arith.maximumf %84, %85 : vector<16x128xf32>
    %87 = vector.broadcast %79 : vector<1x128xf32> to vector<16x128xf32>
    %88 = arith.subf %87, %6 : vector<16x128xf32>
    %89 = math.absf %88 : vector<16x128xf32>
    %cst_41 = arith.constant 1.000000e+00 : f32
    %90 = vector.broadcast %cst_41 : f32 to vector<16x128xf32>
    %91 = arith.subf %90, %89 : vector<16x128xf32>
    %cst_42 = arith.constant 0.000000e+00 : f32
    %92 = vector.broadcast %cst_42 : f32 to vector<16x128xf32>
    %93 = arith.maximumf %91, %92 : vector<16x128xf32>
    %94 = vector.shape_cast %93 : vector<16x128xf32> to vector<16x1x128xf32>
    %95 = vector.shape_cast %86 : vector<16x128xf32> to vector<1x16x128xf32>
    %96 = vector.broadcast %94 : vector<16x1x128xf32> to vector<16x16x128xf32>
    %97 = vector.broadcast %95 : vector<1x16x128xf32> to vector<16x16x128xf32>
    %98 = arith.mulf %96, %97 : vector<16x16x128xf32>
    %99 = vector.shape_cast %98 : vector<16x16x128xf32> to vector<256x128xf32>
    %100 = arith.truncf %99 : vector<256x128xf32> to vector<256x128xbf16>
    %cst_43 = arith.constant dense<0.000000e+00> : vector<32x128xf32>
    %101 = tpu.matmul %2, %100, %cst_43 {dimension_numbers = #tpu.dot_dimension_numbers<[1], [0], [0], [1], [0, 0, 1, 1], [], []>} : vector<32x256xbf16>, vector<256x128xbf16>, vector<32x128xf32> -> vector<32x128xf32>
    %c0_44 = arith.constant 0 : index
    %c0_45 = arith.constant 0 : index
    %c8 = arith.constant 8 : index
    %c0_46 = arith.constant 0 : index
    %102 = vector.load %arg6[%c0_44, %c0_45, %c8, %c0_46] : memref<1x1x16x128xbf16, #tpu.memory_space<vmem>>, vector<1x1x4x128xbf16>
    %103 = vector.shape_cast %102 : vector<1x1x4x128xbf16> to vector<4x128xbf16>
    %104 = arith.extf %103 : vector<4x128xbf16> to vector<4x128xf32>
    %105 = vector.shape_cast %104 : vector<4x128xf32> to vector<4x1x128xf32>
    %106 = vector.shape_cast %101 : vector<32x128xf32> to vector<4x8x128xf32>
    %107 = vector.broadcast %105 : vector<4x1x128xf32> to vector<4x8x128xf32>
    %108 = arith.mulf %107, %106 : vector<4x8x128xf32>
    %109 = arith.addf %75, %108 : vector<4x8x128xf32>
    %c0_47 = arith.constant 0 : index
    %c0_48 = arith.constant 0 : index
    %c3 = arith.constant 3 : index
    %c0_49 = arith.constant 0 : index
    %110 = vector.load %arg5[%c0_47, %c0_48, %c3, %c0_49] : memref<1x1x8x128xf32, #tpu.memory_space<vmem>>, vector<1x1x1x128xf32>
    %111 = vector.shape_cast %110 : vector<1x1x1x128xf32> to vector<1x128xf32>
    %c0_50 = arith.constant 0 : index
    %c0_51 = arith.constant 0 : index
    %c7 = arith.constant 7 : index
    %c0_52 = arith.constant 0 : index
    %112 = vector.load %arg5[%c0_50, %c0_51, %c7, %c0_52] : memref<1x1x8x128xf32, #tpu.memory_space<vmem>>, vector<1x1x1x128xf32>
    %113 = vector.shape_cast %112 : vector<1x1x1x128xf32> to vector<1x128xf32>
    %114 = vector.broadcast %111 : vector<1x128xf32> to vector<16x128xf32>
    %115 = arith.subf %114, %4 : vector<16x128xf32>
    %116 = math.absf %115 : vector<16x128xf32>
    %cst_53 = arith.constant 1.000000e+00 : f32
    %117 = vector.broadcast %cst_53 : f32 to vector<16x128xf32>
    %118 = arith.subf %117, %116 : vector<16x128xf32>
    %cst_54 = arith.constant 0.000000e+00 : f32
    %119 = vector.broadcast %cst_54 : f32 to vector<16x128xf32>
    %120 = arith.maximumf %118, %119 : vector<16x128xf32>
    %121 = vector.broadcast %113 : vector<1x128xf32> to vector<16x128xf32>
    %122 = arith.subf %121, %6 : vector<16x128xf32>
    %123 = math.absf %122 : vector<16x128xf32>
    %cst_55 = arith.constant 1.000000e+00 : f32
    %124 = vector.broadcast %cst_55 : f32 to vector<16x128xf32>
    %125 = arith.subf %124, %123 : vector<16x128xf32>
    %cst_56 = arith.constant 0.000000e+00 : f32
    %126 = vector.broadcast %cst_56 : f32 to vector<16x128xf32>
    %127 = arith.maximumf %125, %126 : vector<16x128xf32>
    %128 = vector.shape_cast %127 : vector<16x128xf32> to vector<16x1x128xf32>
    %129 = vector.shape_cast %120 : vector<16x128xf32> to vector<1x16x128xf32>
    %130 = vector.broadcast %128 : vector<16x1x128xf32> to vector<16x16x128xf32>
    %131 = vector.broadcast %129 : vector<1x16x128xf32> to vector<16x16x128xf32>
    %132 = arith.mulf %130, %131 : vector<16x16x128xf32>
    %133 = vector.shape_cast %132 : vector<16x16x128xf32> to vector<256x128xf32>
    %134 = arith.truncf %133 : vector<256x128xf32> to vector<256x128xbf16>
    %cst_57 = arith.constant dense<0.000000e+00> : vector<32x128xf32>
    %135 = tpu.matmul %2, %134, %cst_57 {dimension_numbers = #tpu.dot_dimension_numbers<[1], [0], [0], [1], [0, 0, 1, 1], [], []>} : vector<32x256xbf16>, vector<256x128xbf16>, vector<32x128xf32> -> vector<32x128xf32>
    %c0_58 = arith.constant 0 : index
    %c0_59 = arith.constant 0 : index
    %c12 = arith.constant 12 : index
    %c0_60 = arith.constant 0 : index
    %136 = vector.load %arg6[%c0_58, %c0_59, %c12, %c0_60] : memref<1x1x16x128xbf16, #tpu.memory_space<vmem>>, vector<1x1x4x128xbf16>
    %137 = vector.shape_cast %136 : vector<1x1x4x128xbf16> to vector<4x128xbf16>
    %138 = arith.extf %137 : vector<4x128xbf16> to vector<4x128xf32>
    %139 = vector.shape_cast %138 : vector<4x128xf32> to vector<4x1x128xf32>
    %140 = vector.shape_cast %135 : vector<32x128xf32> to vector<4x8x128xf32>
    %141 = vector.broadcast %139 : vector<4x1x128xf32> to vector<4x8x128xf32>
    %142 = arith.mulf %141, %140 : vector<4x8x128xf32>
    %143 = arith.addf %109, %142 : vector<4x8x128xf32>
    %c0_i32 = arith.constant 0 : i32
    %144 = arith.cmpi eq, %arg2, %c0_i32 : i32
    %145 = arith.extui %144 : i1 to i32
    %c0_i32_61 = arith.constant 0 : i32
    %146 = arith.cmpi ne, %145, %c0_i32_61 : i32
    scf.if %146 {
      %153 = vector.shape_cast %143 : vector<4x8x128xf32> to vector<32x128xf32>
      %c0_65 = arith.constant 0 : index
      %c0_66 = arith.constant 0 : index
      %154 = vector.load %arg10[%c0_65, %c0_66] : memref<32x128xf32, #tpu.memory_space<vmem>>, vector<32x128xf32>
      tpu.vector_store %arg10[%c0_65, %c0_66], %153 {strides = array<i32>} : memref<32x128xf32, #tpu.memory_space<vmem>>, vector<32x128xf32>,
    } else {
    }
    %c0_i32_62 = arith.constant 0 : i32
    %147 = arith.cmpi sgt, %arg2, %c0_i32_62 : i32
    %148 = arith.extui %147 : i1 to i32
    %c0_i32_63 = arith.constant 0 : i32
    %149 = arith.cmpi ne, %148, %c0_i32_63 : i32
    scf.if %149 {
      %c0_65 = arith.constant 0 : index
      %c0_66 = arith.constant 0 : index
      %153 = vector.load %arg10[%c0_65, %c0_66] : memref<32x128xf32, #tpu.memory_space<vmem>>, vector<32x128xf32>
      %154 = vector.shape_cast %143 : vector<4x8x128xf32> to vector<32x128xf32>
      %155 = arith.addf %153, %154 : vector<32x128xf32>
      %c0_67 = arith.constant 0 : index
      %c0_68 = arith.constant 0 : index
      %156 = vector.load %arg10[%c0_67, %c0_68] : memref<32x128xf32, #tpu.memory_space<vmem>>, vector<32x128xf32>
      tpu.vector_store %arg10[%c0_67, %c0_68], %155 {strides = array<i32>} : memref<32x128xf32, #tpu.memory_space<vmem>>, vector<32x128xf32>,
    } else {
    }
    %c2_i32 = arith.constant 2 : i32
    %150 = arith.cmpi eq, %arg2, %c2_i32 : i32
    %151 = arith.extui %150 : i1 to i32
    %c0_i32_64 = arith.constant 0 : i32
    %152 = arith.cmpi ne, %151, %c0_i32_64 : i32
    scf.if %152 {
      %c0_65 = arith.constant 0 : index
      %c0_66 = arith.constant 0 : index
      %153 = vector.load %arg7[%c0_65, %c0_66] : memref<32x32xbf16, #tpu.memory_space<vmem>>, vector<32x32xbf16>
      %c0_67 = arith.constant 0 : index
      %c0_68 = arith.constant 0 : index
      %154 = vector.load %arg10[%c0_67, %c0_68] : memref<32x128xf32, #tpu.memory_space<vmem>>, vector<32x128xf32>
      %155 = arith.truncf %154 : vector<32x128xf32> to vector<32x128xbf16>
      %cst_69 = arith.constant dense<0.000000e+00> : vector<32x128xf32>
      %156 = tpu.matmul %153, %155, %cst_69 {dimension_numbers = #tpu.dot_dimension_numbers<[1], [0], [0], [1], [0, 0, 1, 1], [], []>} : vector<32x32xbf16>, vector<32x128xbf16>, vector<32x128xf32> -> vector<32x128xf32>
      %c0_70 = arith.constant 0 : index
      %c0_71 = arith.constant 0 : index
      %157 = vector.load %arg8[%c0_70, %c0_71] : memref<32x1xf32, #tpu.memory_space<vmem>>, vector<32x1xf32>
      %158 = vector.broadcast %157 : vector<32x1xf32> to vector<32x128xf32>
      %159 = arith.addf %156, %158 : vector<32x128xf32>
      %c0_72 = arith.constant 0 : index
      %c0_73 = arith.constant 0 : index
      %c0_74 = arith.constant 0 : index
      %160 = vector.load %arg3[%c0_72, %c0_73, %c0_74] : memref<1x32x128xf32, #tpu.memory_space<vmem>>, vector<1x32x128xf32>
      %161 = vector.shape_cast %160 : vector<1x32x128xf32> to vector<32x128xf32>
      %162 = arith.addf %159, %161 : vector<32x128xf32>
      %c0_75 = arith.constant 0 : index
      %c0_76 = arith.constant 0 : index
      %c0_77 = arith.constant 0 : index
      %163 = vector.load %arg9[%c0_75, %c0_76, %c0_77] : memref<1x32x128xf32, #tpu.memory_space<vmem>>, vector<1x32x128xf32>
      %164 = vector.shape_cast %163 : vector<1x32x128xf32> to vector<32x128xf32>
      %165 = vector.shape_cast %162 : vector<32x128xf32> to vector<1x32x128xf32>
      tpu.vector_store %arg9[%c0_75, %c0_76, %c0_77], %165 {strides = array<i32>} : memref<1x32x128xf32, #tpu.memory_space<vmem>>, vector<1x32x128xf32>,
    } else {
    }
    return
  }
  func.func @transform_0(%arg0: i32, %arg1: i32, %arg2: i32) -> (i32, i32, i32) {
    %c0_i32 = arith.constant 0 : i32
    %c0_i32_0 = arith.constant 0 : i32
    return %arg0, %c0_i32, %arg1 : i32, i32, i32
  }
  func.func @transform_1(%arg0: i32, %arg1: i32, %arg2: i32) -> (i32, i32, i32, i32) {
    %c0_i32 = arith.constant 0 : i32
    %c0_i32_0 = arith.constant 0 : i32
    %c0_i32_1 = arith.constant 0 : i32
    %c0_i32_2 = arith.constant 0 : i32
    return %arg0, %c0_i32, %c0_i32_0, %c0_i32_1 : i32, i32, i32, i32
  }
  func.func @transform_2(%arg0: i32, %arg1: i32, %arg2: i32) -> (i32, i32, i32, i32) {
    %c0_i32 = arith.constant 0 : i32
    %c0_i32_0 = arith.constant 0 : i32
    return %arg0, %arg2, %c0_i32, %arg1 : i32, i32, i32, i32
  }
  func.func @transform_3(%arg0: i32, %arg1: i32, %arg2: i32) -> (i32, i32, i32, i32) {
    %c0_i32 = arith.constant 0 : i32
    %c0_i32_0 = arith.constant 0 : i32
    return %arg0, %arg2, %c0_i32, %arg1 : i32, i32, i32, i32
  }
  func.func @transform_4(%arg0: i32, %arg1: i32, %arg2: i32) -> (i32, i32) {
    %c0_i32 = arith.constant 0 : i32
    %c0_i32_0 = arith.constant 0 : i32
    %c0_i32_1 = arith.constant 0 : i32
    return %c0_i32, %c0_i32_0 : i32, i32
  }
  func.func @transform_5(%arg0: i32, %arg1: i32, %arg2: i32) -> (i32, i32) {
    %c0_i32 = arith.constant 0 : i32
    %c0_i32_0 = arith.constant 0 : i32
    %c0_i32_1 = arith.constant 0 : i32
    return %c0_i32, %c0_i32_0 : i32, i32
  }
  func.func @transform_6(%arg0: i32, %arg1: i32, %arg2: i32) -> (i32, i32, i32) {
    %c0_i32 = arith.constant 0 : i32
    %c0_i32_0 = arith.constant 0 : i32
    return %arg0, %c0_i32, %arg1 : i32, i32, i32
  }
}

</mosaic_0001>

<bundles_post_ra>
// kernel: tpu_custom_call.1
= control target key start
LH: loop header
LB: loop body
LE: loop exit
PB: predicated region body
PF: predicated region fallthrough
CT: control target
= control target key end

     0   :  { %s3655_s0 = inlined_call_operand.hbm [shape: f32[2,32,128], index: 0, kind: input, shape index: {}]   ;;  %s3656_s1 = inlined_call_operand.hbm [shape: bf16[2,3,32,256], index: 1, kind: input, shape index: {}]   ;;  %s3657_s2 = inlined_call_operand.hbm [shape: f32[2,3,8,128], index: 2, kind: input, shape index: {}]   ;;  %s3658_s3 = inlined_call_operand.hbm [shape: bf16[2,3,16,128], index: 3, kind: input, shape index: {}]   ;;  %s3659_s4 = inlined_call_operand.vmem [shape: bf16[32,32], index: 4, kind: input, shape index: {}]   ;;  %s3660_s5 = inlined_call_operand.vmem [shape: f32[32,1], index: 5, kind: input, shape index: {}]   ;;  %s3661_s6 = inlined_call_operand.hbm [shape: f32[2,32,128], index: 6, kind: output, shape index: {}]  }
   0x1   :  { %3676 = sst [smem:[#allocation25_spill]] %s3655_s0 }
   0x2   :  { %3677 = sst [smem:[#allocation26_spill]] %s3656_s1 }
   0x3   :  { %3678 = sst [smem:[#allocation27_spill]] %s3659_s4 }
   0x4   :  { %3679 = sst [smem:[#allocation28_spill]] %s3660_s5 }
   0x5   :  { %3680 = sst [smem:[#allocation29_spill]] %s3661_s6 }
   0x6   :  { %11 = vsyncpa [#allocation4], 0 }
   0x7   :  { %13 = vsyncpa [#allocation4 + $0x1], 0 }
   0x8   :  { %14 = vsyncpa [#allocation7], 0 }
   0x9   :  { %16 = vsyncpa [#allocation7 + $0x1], 0 }
   0xa   :  { %17 = vsyncpa [#allocation10], 0 }
   0xb   :  { %19 = vsyncpa [#allocation10 + $0x1], 0 }
   0xc   :  { %20 = vsyncpa [#allocation5], 0 }
   0xd   :  { %22 = vsyncpa [#allocation5 + $0x1], 0  ;;  %s2815_s21 = smov 0   ;;  %s2817_s22 = smov 0  }
   0xe   :  { %s2819_s23 = smov 0   ;;  %s2821_s24 = smov 0  }
   0xf   :  { %s2823_s25 = smov 0   ;;  %s2825_s26 = smov 0  }
  0x10   :  { %s2827_s27 = smov 0   ;;  %s2829_s28 = smov 0  }
  0x11   :  { %s2831_s29 = smov 0   ;;  %s2833_s30 = smov 0  }
  0x12   :  { %s2835_s7 = smov 0  }
  0x13 LB: > { %3681 = sst [smem:[#allocation17_spill]] %s2729_s22  ;;  %s2871_s8 = sadd.s32 4294967295, %s2765_s7   ;;  %s2765_s7 = sphi %s2835_s7, %s28_s7   ;;  %s2761_s30 = sphi %s2833_s30, %s3727_s30   ;;  %s2757_s29 = sphi %s2831_s29, %s3726_s29   ;;  %s2753_s28 = sphi %s2829_s28, %s3725_s28   ;;  %s2749_s27 = sphi %s2827_s27, %s3724_s27   ;;  %s2745_s26 = sphi %s2825_s26, %s3723_s26   ;;  %s2741_s25 = sphi %s2823_s25, %s3722_s25   ;;  %s2737_s24 = sphi %s2821_s24, %s3721_s24   ;;  %s2733_s23 = sphi %s2819_s23, %s3720_s23   ;;  %s2729_s22 = sphi %s2817_s22, %s3719_s22   ;;  %s2725_s21 = sphi %s2815_s21, %s3718_s21  }
  0x14   : > { %3682 = sst [smem:[#allocation18_spill]] %s2737_s24  ;;  %s2211_s9 = sadd.s32 4294967294, %s2765_s7  }
  0x15   : > { %3683 = sst [smem:[#allocation19_spill]] %s2749_s27  ;;  %p63_p0 = scmp.ne.s32.totalorder %s2745_s26, %s2741_s25 }
  0x16   : > { %3684 = sst [smem:[#allocation20_spill]] %s2753_s28  ;;  %p3668_p1 = scmp.eq.s32.totalorder %s2765_s7, 0 }
  0x17   : > { %p69_p2 = scmp.ne.s32.totalorder %s2741_s25, %s2737_s24  ;;  %p223_p3 = scmp.eq.s32.totalorder %s2871_s8, 5 }
  0x18   : > { %p229_p4 = scmp.eq.s32.totalorder %s2211_s9, 5  ;;  %p65_p5 = por %p3668_p1, %p63_p0 }
  0x19   : > { %p2883_p6 = por %p223_p3, %p63_p0  ;;  %p3667_p8 = scmp.lt.s32.totalorder %s2765_s7, 6 }
  0x1a   : > { %p2890_p7 = por %p229_p4, %p69_p2  ;;  %s2896_s13 = sand.u32 1, %s2745_s26  }
  0x1b   : > { %s3685_s11 = scalar_select %p2883_p6, 1, 0 }
  0x1c   : > { %s3687_s12 = scalar_select %p2890_p7, 1, 0 }
  0x1d   : > { %3686 = sst [smem:[#allocation21_spill]] %s3685_s11  ;;  %p2900_p9 = pnand %p3667_p8, %p65_p5 }
  0x1e   : > { %3688 = sst [smem:[#allocation22_spill]] %s3687_s12  ;;  %s277_s15 = sand.u32 1, %s2765_s7  }
  0x1f   : > { %s2381_s16 = smul.u32 96, %s2896_s13  ;;  %p2223_p10 = scmp.ge.s32.totalorder %s2765_s7, 1 }
  0x20   : > { %s2382_s17 = smul.u32 1536, %s2761_s30  ;;  %s3690_s1 = sld [smem:[#allocation26_spill]] }
  0x21   : > { %s281_s9 = scalar_lea.vmem [#allocation6], %s2381_s16  ;;  %p341_p11 = scmp.lt.s32.totalorder %s2765_s7, 7 }
  0x22   : > { %s288_s10 = sshll.u32 %s281_s9, 4  ;;  %s2912_s12 = scalar_lea.sflag [#allocation7], %s277_s15  ;;  %s289_s10 = int_to_ptr.vmem [resolvable:$true] %s288_s10 }
  0x23   : > { %p2523_p12 = pneg %p2900_p9  ;;  %s2534_s6 = scalar_lea.vmem %s289_s10, 1536 }
  0x24   : > { %p2535_p13 = scmp.ne.s32.totalorder %s289_s10, %s2534_s6  ;;  %s2767_s11 = smov [#allocation6]  }
  0x25   : > { %s2539_s28 = sshll.u32 %s2767_s11, 4  ;;  %s2540_s28 = int_to_ptr.vmem [resolvable:$false] %s2539_s28 }
  0x26   : > { %s287_s20 = scalar_lea.hbm %s3690_s1, %s2382_s17  ;;  %p2537_p0 = pnand %p2535_p13, %p2523_p12 }
  0x27   : > { %s2541_s5 = scalar_lea.vmem %s2540_s28, 3072  ;;  %p2542_p4 = scmp.lt.s32.totalorder %s289_s10, %s2540_s28 }
  0x28   : > { %p2538_p3 = pneg %p2537_p0  ;;  %p2543_p5 = scmp.lt.s32.totalorder %s2541_s5, %s2534_s6 }
  0x2a   : > { %p2544_p8 = por %p2543_p5, %p2542_p4 }
  0x2c   : > { %p2545_p1 = pnand %p2544_p8, %p2538_p3 }
  0x2e   : > { %2548 = shalt.err (!%p2545_p1)
}
  0x2f   : > { %s2768_s16 = smov 128   ;;  %s2769_s15 = smov 8  }
  0x30   : > { %2402 = dma.hbm_to_vmem [thread:$0]  (!%p2900_p9), %s287_s20, 1536, %s289_s10, %s2912_s12, %s2768_s16, %s2768_s16, %s2769_s15  }
  0x31   : > { %p2926_p13 = pnand %p2223_p10, %p341_p11  ;;  %s2214_s5 = sshll.u32 %s2896_s13, 5 }
  0x32   : > { %s2254_s6 = sshll.u32 %s2761_s30, 9  ;;  %s3692_s0 = sld [smem:[#allocation25_spill]] }
  0x33   : > { %s259_s19 = scalar_lea.vmem [#allocation3], %s2214_s5  ;;  %s256_s1 = scalar_lea.sflag [#allocation4], %s2896_s13 }
  0x34   : > { %s267_s9 = sshll.u32 %s259_s19, 4  ;;  %s2770_s10 = smov [#allocation3]   ;;  %s268_s9 = int_to_ptr.vmem [resolvable:$true] %s267_s9 }
  0x35   : > { %s2562_s4 = scalar_lea.vmem %s268_s9, 512  ;;  %s2567_s20 = sshll.u32 %s2770_s10, 4  ;;  %s2568_s20 = int_to_ptr.vmem [resolvable:$false] %s2567_s20 }
  0x36   : > { %p2563_p1 = scmp.ne.s32.totalorder %s268_s9, %s2562_s4  ;;  %s2569_s27 = scalar_lea.vmem %s2568_s20, 1024 }
  0x37   : > { %p2570_p10 = scmp.lt.s32.totalorder %s268_s9, %s2568_s20  ;;  %p2571_p11 = scmp.lt.s32.totalorder %s2569_s27, %s2562_s4 }
  0x38   : > { %s266_s18 = scalar_lea.hbm %s3692_s0, %s2254_s6  ;;  %p2565_p8 = pnand %p2563_p1, %p2523_p12 }
  0x39   : > { %p2572_p3 = por %p2571_p11, %p2570_p10 }
  0x3a   : > { %p2566_p0 = pneg %p2565_p8 }
  0x3c   : > { %p2573_p4 = pnand %p2572_p3, %p2566_p0 }
  0x3e   : > { %2576 = shalt.err (!%p2573_p4)
}
  0x3f   : > { %2399 = dma.hbm_to_vmem [thread:$0]  (!%p2900_p9), %s266_s18, 512, %s268_s9, %s256_s1, %s2768_s16, %s2768_s16, %s2769_s15  }
  0x40   : > { %s40_s4 = sadd.s32 1, %s2757_s29  ;;  %s47_s27 = sadd.s32 1, %s2761_s30 }
  0x41   : > { %p41_p12 = scmp.ge.s32.totalorder %s40_s4, 3  ;;  %p70_p5 = scmp.eq.s32.totalorder %s2871_s8, 0 }
  0x42   : > { %s112_s13 = sadd.s32 1, %s2733_s23  ;;  %p119_p1 = scmp.ne.s32.totalorder %s2733_s23, %s2729_s22 }
  0x43   : > { %s3729_s4 = smov (%p41_p12, %s40_s4), 0  ;;  %s3731_s27 = smov (!%p41_p12, %s47_s27), %s2761_s30 }
  0x44   : > { %3693 = sst [smem:[#allocation23_spill]] %s3729_s4  ;;  %p2953_p8 = por %p70_p5, %p69_p2 }
  0x45   : > { %s106_s1 = ssub.s32 %s2757_s29, %s3729_s4  ;;  %p49_p9 = scmp.ge.s32.totalorder %s3731_s27, 2 }
  0x46   : > { %p3695_p0 = scmp.eq.s32.totalorder %s2765_s7, 0  ;;  %p125_p11 = scmp.ne.s32.totalorder %s2729_s22, %s2725_s21 }
  0x47   : > { %s300_s15 = sand.u32 1, %s2733_s23   ;;  %s3733_s27 = smov (%p49_p9, %s3731_s27), 0 }
  0x48   : > { %p2961_p10 = por %p119_p1, %p3695_p0  ;;  %p2970_p3 = por %p125_p11, %p70_p5 }
  0x49   : > { %s2218_s6 = sshll.u32 %s300_s15, 3  ;;  %s51_s11 = ssub.s32 %s2761_s30, %s3733_s27 }
  0x4a   : > { %s3697_s5 = scalar_select %p2970_p3, 1, 0 }
  0x4b   : > { %p54_p2 = scmp.eq.s32.totalorder %s51_s11, 0  ;;  %s107_s17 = sor.u32 %s106_s1, %s51_s11 }
  0x4c   : > { %3698 = sst [smem:[#allocation24_spill]] %s3697_s5  ;;  %p110_p4 = scmp.eq.s32.totalorder %s107_s17, 0 }
  0x4d   : > { %s2383_s18 = smul.u32 3, %s2761_s30  ;;  %s3699_s19 = sadd.s32 1, %s2745_s26 }
  0x4e   : > { %s2982_s9 = scalar_select %p54_p2, %s2745_s26, %s3699_s19  }
  0x4f   : > { %s2985_s21 = scalar_select %p110_p4, %s2733_s23, %s112_s13  }
  0x50   : > { %s308_s10 = sadd.s32 %s2757_s29, %s2383_s18  ;;  %s302_s20 = scalar_lea.vmem [#allocation8], %s2218_s6 }
  0x51   : > { %s312_s0 = sshll.u32 %s302_s20, 4  ;;  %s2219_s4 = sshll.u32 %s308_s10, 7  ;;  %s313_s0 = int_to_ptr.vmem [resolvable:$true] %s312_s0 }
  0x52   : > { %s310_s5 = scalar_lea.hbm %s3657_s2, %s2219_s4  ;;  %p3700_p12 = scmp.lt.s32.totalorder %s2765_s7, 6 }
  0x53   : > { %s323_s11 = scalar_lea.vmem [#allocation9], %s2218_s6  ;;  %s2590_s17 = scalar_lea.vmem %s313_s0, 128 }
  0x54   : > { %p2995_p5 = pnand %p3700_p12, %p2961_p10  ;;  %s333_s13 = sshll.u32 %s323_s11, 4  ;;  %s334_s13 = int_to_ptr.vmem [resolvable:$true] %s333_s13 }
  0x55   : > { %p2591_p9 = scmp.ne.s32.totalorder %s313_s0, %s2590_s17  ;;  %s2771_s22 = smov [#allocation8]  }
  0x56   : > { %p2579_p1 = pneg %p2995_p5  ;;  %s2595_s24 = sshll.u32 %s2771_s22, 4  ;;  %s2596_s24 = int_to_ptr.vmem [resolvable:$false] %s2595_s24 }
  0x57   : > { %s2597_s4 = scalar_lea.vmem %s2596_s24, 256  ;;  %p2598_p10 = scmp.lt.s32.totalorder %s313_s0, %s2596_s24 }
  0x58   : > { %p2593_p0 = pnand %p2591_p9, %p2579_p1  ;;  %p2599_p2 = scmp.lt.s32.totalorder %s2597_s4, %s2590_s17 }
  0x5a   : > { %p2594_p11 = pneg %p2593_p0  ;;  %p2600_p4 = por %p2599_p2, %p2598_p10 }
  0x5c   : > { %p2601_p12 = pnand %p2600_p4, %p2594_p11 }
  0x5e   : > { %2604 = shalt.err (!%p2601_p12)
}
  0x5f   : > { %2405 = dma.hbm_to_vmem [thread:$0]  (!%p2995_p5), %s310_s5, 128, %s313_s0, %s2912_s12  }
  0x60   : > { %s2221_s16 = sshll.u32 %s2757_s29, 1  ;;  %s2384_s6 = smul.u32 6, %s2761_s30 }
  0x61   : > { %s320_s17 = scalar_lea.sflag [#allocation10], %s300_s15  ;;  %s2618_s22 = scalar_lea.vmem %s334_s13, 128 }
  0x62   : > { %s330_s18 = sadd.s32 %s2384_s6, %s2221_s16  ;;  %p2619_p9 = scmp.ne.s32.totalorder %s334_s13, %s2618_s22 }
  0x63   : > { %s2222_s19 = sshll.u32 %s330_s18, 6  ;;  %s2772_s24 = smov [#allocation9]  }
  0x64   : > { %s332_s11 = scalar_lea.hbm %s3658_s3, %s2222_s19  ;;  %p2621_p0 = pnand %p2619_p9, %p2579_p1 }
  0x65   : > { %s2623_s4 = sshll.u32 %s2772_s24, 4  ;;  %s2624_s4 = int_to_ptr.vmem [resolvable:$false] %s2623_s4 }
  0x66   : > { %p2622_p11 = pneg %p2621_p0  ;;  %s2625_s0 = scalar_lea.vmem %s2624_s4, 256 }
  0x67   : > { %p2626_p10 = scmp.lt.s32.totalorder %s334_s13, %s2624_s4  ;;  %p2627_p2 = scmp.lt.s32.totalorder %s2625_s0, %s2618_s22 }
  0x69   : > { %p2628_p4 = por %p2627_p2, %p2626_p10 }
  0x6b   : > { %p2629_p12 = pnand %p2628_p4, %p2622_p11 }
  0x6d   : > { %2632 = shalt.err (!%p2629_p12)
}
  0x6e   : > { %s2773_s12 = smov 64   ;;  %s2774_s5 = smov 4  }
  0x6f   : > { %2408 = dma.hbm_to_vmem [thread:$0]  (!%p2995_p5), %s332_s11, 128, %s334_s13, %s320_s17, %s2773_s12, %s2773_s12, %s2774_s5  }
  0x70   : > { %345 = sbr.rel (%p2926_p13) target bundleno = 744 (0x2e8), region = 44  ;;  %s3022_s15 = sand.u32 (!%p2926_p13), 1, %s2741_s25  }
  0x71   : > { %s2224_s16 = sshll.u32 (!%p2926_p13), %s3022_s15, 5  ;;  %s348_s6 = scalar_lea.sflag (!%p2926_p13), [#allocation4], %s3022_s15 }
  0x72   : > { %s3028_s18 = scalar_lea.vmem (!%p2926_p13), [#allocation3], %s2224_s16 }
  0x75   : > { %2704 = dma.done.wait (%p2953_p8), %s348_s6, 512  }
  0x76   : > { %2706 = vsyncadd (%p2953_p8), %s348_s6, 4294966784  ;;  %s356_s28 = sand.u32 1, %s2871_s8   ;;  %s2385_s1 = smul.u32 96, %s3022_s15 }
  0x77   : > { %s357_s13 = scalar_lea.sflag [#allocation7], %s356_s28 }
  0x78   : > { %s360_s19 = scalar_lea.vmem [#allocation6], %s2385_s1 }
  0x79   : > { %2708 = dma.done.wait (%p2953_p8), %s357_s13, 1536  }
  0x7a   : > { %2710 = vsyncadd (%p2953_p8), %s357_s13, 4294965760  ;;  %s3702_s10 = sld [smem:[#allocation17_spill]] }
  0x80   : > { %s367_s11 = sand.u32 1, %s3702_s10  }
  0x81   : > { %s2225_s17 = sshll.u32 %s367_s11, 3 }
  0x82   : > { %s3041_s22 = scalar_lea.vmem [#allocation8], %s2225_s17 }
  0x83   : > { %2712 = dma.done.wait (%p2970_p3), %s357_s13, 128  }
  0x84   : > { %2714 = vsyncadd (%p2970_p3), %s357_s13, 4294967168  ;;  %s375_s8 = scalar_lea.sflag [#allocation10], %s367_s11  ;;  %s3047_s24 = scalar_lea.vmem [#allocation9], %s2225_s17 }
  0x85   : > { %2716 = dma.done.wait (%p2970_p3), %s375_s8, 128  }
  0x86   : > { %2718 = vsyncadd (%p2970_p3), %s375_s8, 4294967168  ;;  %s3704_s14 = sld [smem:[#allocation19_spill]]  ;;  %v430_v0 = vlaneseq  ;;  %v2775_v5 = vmov 1966171168   ;;  %v2230_v7 = vld [vmem:[%s3041_s22] ss:$0 sm:$0xff] }
  0x87   : > { %v465_v6 = vunpack.c.l.s4 %v2775_v5  ;;  %v2231_v8 = vld [vmem:[%s3041_s22 + $0x4] ss:$0 sm:$0xff]  ;;  %v2236_v9 = vld [vmem:[%s3041_s22 + $0x1] ss:$0 sm:$0xff]  ;;  %v2238_v14 = vld [vmem:[%s3041_s22 + $0x2] ss:$0 sm:$0xff] }
  0x88   : > { %v431_v1 = vshrl.u32 %v430_v0, 7  ;;  %v2237_v15 = vld [vmem:[%s3041_s22 + $0x5] ss:$0 sm:$0xff]  ;;  %v3076_v26 = vld [vmem:[%s3041_s22 + $0x3] ss:$0 sm:$0xff]  ;;  %s3553_s12 = scalar_lea.vmem [#allocation11], %s2224_s16 }
  0x89   : > { %v466_v22 = vunpack.c.0.s8 %v465_v6  ;;  %v3097_v44 = vld [vmem:[%s3041_s22 + $0x6] ss:$0 sm:$0xff] }
  0x8a   : > { %v432_v2 = vadd.s32 8, %v431_v1  ;;  %v3054_v3 = vcvt.s32.f32 %v431_v1  ;;  %v3085_v36 = vsub.s32 0, %v431_v1 }
  0x8b   : > { %v3083_v33 = vsub.s32 %v466_v22, %v431_v1 }
  0x8c   : > { %s2255_s4 = sshll.u32 %s3704_s14, 5  ;;  %v3056_v4 = vcvt.s32.f32 %v432_v2  ;;  %v441_v10 = vsub.f32 %v2230_v7, %v3054_v3  ;;  %v819_v13 = vsub.f32 %v2236_v9, %v3054_v3  ;;  %v1178_v17 = vsub.f32 %v2238_v14, %v3054_v3  ;;  %p2242_p13 = scmp.ne.s32.totalorder %s3704_s14, 0 }
  0x8d   : > { %s3058_s0 = scalar_lea.vmem %s360_s19, %s2255_s4 [#allocation6]  ;;  %v1536_v38 = vsub.f32 %v3076_v26, %v3054_v3  ;;  %v453_v46 = vsub.f32 %v2231_v8, %v3054_v3  ;;  %v831_v47 = vsub.f32 %v2237_v15, %v3054_v3  ;;  %v1190_v56 = vsub.f32 %v3097_v44, %v3054_v3 }
  0x8e   : > { %v442_v11 = vsub.f32 %v2230_v7, %v3056_v4  ;;  %v454_v12 = vsub.f32 %v2231_v8, %v3056_v4  ;;  %v820_v16 = vsub.f32 %v2236_v9, %v3056_v4  ;;  %v3072_v18 = vld [vmem:[%s3058_s0 + $0x4] ss:$8 sps:$4 sm:$0xff]   ;;  %v443_v19 = vand.u32 2147483647, %v441_v10 }
  0x8f   : > { %v821_v23 = vand.u32 2147483647, %v819_v13  ;;  %v1179_v25 = vsub.f32 %v2238_v14, %v3056_v4  ;;  %741 = vmatprep.mubr.bf16.mxu0 %v3072_v18  ;;  %1099 = vmatprep.mubr.bf16.mxu1 %v3072_v18  ;;  %v3080_v29 = vand.u32 2147483647, %v1178_v17  ;;  %v832_v30 = vsub.f32 %v2237_v15, %v3056_v4 }
  0x90   : > { %v444_v20 = vand.u32 2147483647, %v442_v11  ;;  %v456_v21 = vand.u32 2147483647, %v454_v12  ;;  %v822_v24 = vand.u32 2147483647, %v820_v16  ;;  %v1537_v39 = vsub.f32 %v3076_v26, %v3056_v4 }
  0x91   : > { %v445_v27 = vsub.f32 1.0, %v443_v19  ;;  %v823_v34 = vsub.f32 1.0, %v821_v23  ;;  %v3087_v37 = vand.u32 2147483647, %v1179_v25  ;;  %v1182_v42 = vsub.f32 1.0, %v3080_v29 }
  0x92   : > { %v458_v28 = vsub.f32 1.0, %v456_v21  ;;  %v446_v31 = vsub.f32 1.0, %v444_v20  ;;  %v824_v35 = vsub.f32 1.0, %v822_v24  ;;  %v834_v43 = vand.u32 2147483647, %v832_v30 }
  0x93   : > { %v3093_v40 = vmax.f32 %v445_v27, 0.0  ;;  %v3105_v50 = vmax.f32 %v823_v34, 0.0  ;;  %v455_v53 = vand.u32 2147483647, %v453_v46  ;;  %v833_v54 = vand.u32 2147483647, %v831_v47 }
  0x94   : > { %v460_v32 = vmax.f32 %v458_v28, 0.0  ;;  %v3099_v45 = vmax.f32 %v446_v31, 0.0  ;;  %v3107_v51 = vmax.f32 %v824_v35, 0.0  ;;  %v836_v52 = vsub.f32 1.0, %v834_v43 }
  0x95   : > { %v457_v61 = vsub.f32 1.0, %v455_v53  ;;  %v835_v62 = vsub.f32 1.0, %v833_v54  ;;  %v1191_v0 = vsub.f32 %v3097_v44, %v3056_v4 }
  0x96   : > { %v512_v41 = vcombine.high %v460_v32, %v460_v32  ;;  %v519_v48 = vrot.slane %v460_v32, %v3083_v33  ;;  %v838_v58 = vmax.f32 %v836_v52, 0.0 }
  0x97   : > { %v3122_v7 = vmax.f32 %v457_v61, 0.0  ;;  %v3124_v8 = vmax.f32 %v835_v62, 0.0  ;;  %v3230_v29 = vand.u32 2147483647, %v1191_v0 }
  0x98   : > { %v526_v49 = vrot.slane %v512_v41, %v3083_v33  ;;  %v527_v55 = vcombine.high %v519_v48, %v519_v48  ;;  %v3113_v60 = vrot.slane %v519_v48, %v3083_v33  ;;  %v890_v2 = vcombine.high %v838_v58, %v838_v58 }
  0x99   : > { %v3129_v10 = vrot.slane %v838_v58, %v3083_v33  ;;  %v463_v15 = vcombine.high %v3122_v7, %v3122_v7  ;;  %v841_v16 = vcombine.high %v3124_v8, %v3124_v8 }
  0x9a   : > { %v528_v57 = vcombine.high %v526_v49, %v526_v49  ;;  %v542_v59 = vrot.slane %v526_v49, %v3083_v33  ;;  %v3116_v63 = vrot.slane %v527_v55, %v3083_v33  ;;  %v904_v12 = vrot.slane %v890_v2, %v3083_v33 }
  0x9b   : > { %v477_v24 = vrot.slane %v463_v15, %v3083_v33  ;;  %v855_v25 = vrot.slane %v841_v16, %v3083_v33 }
  0x9c   : > { %v556_v1 = vrot.slane %v528_v57, %v3083_v33  ;;  %v558_v5 = vcombine.high %v542_v59, %v542_v59  ;;  %v612_v6 = vrot.slane %v542_v59, %v3085_v36  ;;  %v559_v9 = vcombine.high %v3116_v63, %v3116_v63 }
  0x9d   : > { %v906_v21 = vcombine.high %v904_v12, %v904_v12  ;;  %v920_v27 = vrot.slane %v904_v12, %v3083_v33  ;;  %v479_v35 = vcombine.high %v477_v24, %v477_v24  ;;  %v857_v41 = vcombine.high %v855_v25, %v855_v25 }
  0x9e   : > { %v560_v11 = vcombine.high %v556_v1, %v556_v1  ;;  %v620_v13 = vrot.slane %v558_v5, %v3085_v36  ;;  %v616_v14 = vrot.slane %v556_v1, %v3085_v36  ;;  %v3139_v17 = vmul.f32 %v612_v6, %v3093_v40 }
  0x9f   : > { %v3142_v19 = vmul.f32 %v612_v6, %v3099_v45  ;;  %v934_v32 = vrot.slane %v906_v21, %v3083_v33  ;;  %v936_v43 = vcombine.high %v920_v27, %v920_v27  ;;  %v493_v46 = vrot.slane %v477_v24, %v3083_v33 }
  0xa0   : > { %v624_v20 = vrot.slane %v560_v11, %v3085_v36  ;;  %v3146_v22 = vmul.f32 %v620_v13, %v3093_v40  ;;  %v3149_v23 = vmul.f32 %v620_v13, %v3099_v45  ;;  %v3155_v28 = vmul.f32 %v616_v14, %v3093_v40 }
  0xa1   : > { %v938_v48 = vcombine.high %v934_v32, %v934_v32  ;;  %v871_v49 = vrot.slane %v855_v25, %v3083_v33  ;;  %v3165_v52 = vmul.f32 %v616_v14, %v3099_v45  ;;  %v507_v53 = vrot.slane %v479_v35, %v3083_v33 }
  0xa2   : > { %v671_v30 = vmul.f32 %v624_v20, %v3093_v40  ;;  %v672_v31 = vmul.f32 %v624_v20, %v3099_v45  ;;  %v687_v34 = vpack.c.bf16 %v3149_v23, %v3146_v22  ;;  %v885_v54 = vrot.slane %v857_v41, %v3083_v33 }
  0xa3   : > { %v998_v55 = vrot.slane %v936_v43, %v3085_v36  ;;  %v509_v57 = vcombine.high %v493_v46, %v493_v46  ;;  %v1002_v58 = vrot.slane %v938_v48, %v3085_v36  ;;  %v887_v59 = vcombine.high %v871_v49, %v871_v49 }
  0xa4   : > { %v688_v47 = vpack.c.bf16 %v672_v31, %v671_v30  ;;  %v686_v61 = vpack.c.bf16 %v3165_v52, %v3155_v28  ;;  %v994_v62 = vrot.slane %v934_v32, %v3085_v36  ;;  %v511_v1 = vcombine.high %v507_v53, %v507_v53 }
  0xa5   : > { %v889_v2 = vcombine.high %v885_v54, %v885_v54  ;;  %v1047_v5 = vmul.f32 %v998_v55, %v3105_v50  ;;  %v1048_v6 = vmul.f32 %v998_v55, %v3107_v51  ;;  %v1049_v11 = vmul.f32 %v1002_v58, %v3105_v50 }
  0xa6   : > { %2257 = vmatprep.subr.bf16.mxu0 %v688_v47  ;;  %v1050_v12 = vmul.f32 %v1002_v58, %v3107_v51  ;;  %v588_v13 = vrot.slane %v509_v57, %v3085_v36  ;;  %v966_v14 = vrot.slane %v887_v59, %v3085_v36  ;;  %v592_v15 = vrot.slane %v511_v1, %v3085_v36 }
  0xa7   : > { %v970_v16 = vrot.slane %v889_v2, %v3085_v36  ;;  %v1065_v20 = vpack.c.bf16 %v1048_v6, %v1047_v5  ;;  %v1045_v21 = vmul.f32 %v994_v62, %v3105_v50  ;;  %v1046_v43 = vmul.f32 %v994_v62, %v3107_v51 }
  0xa8   : > { %v1066_v22 = vpack.c.bf16 %v1050_v12, %v1049_v11  ;;  %v653_v23 = vmul.f32 %v588_v13, %v3093_v40  ;;  %v654_v24 = vmul.f32 %v588_v13, %v3099_v45  ;;  %v1031_v25 = vmul.f32 %v966_v14, %v3105_v50 }
  0xa9   : > { %v655_v28 = vmul.f32 %v592_v15, %v3093_v40  ;;  %v656_v30 = vmul.f32 %v592_v15, %v3099_v45  ;;  %v1033_v31 = vmul.f32 %v970_v16, %v3105_v50  ;;  %v1034_v32 = vmul.f32 %v970_v16, %v3107_v51 }
  0xaa   : > { %2285 = vmatprep.subr.bf16.mxu1 %v1066_v22  ;;  %v679_v35 = vpack.c.bf16 %v654_v24, %v653_v23  ;;  %v1032_v41 = vmul.f32 %v966_v14, %v3107_v51  ;;  %v584_v47 = vrot.slane %v507_v53, %v3085_v36  ;;  %v962_v55 = vrot.slane %v885_v54, %v3085_v36 }
  0xab   : > { %v680_v48 = vpack.c.bf16 %v656_v30, %v655_v28  ;;  %v1058_v52 = vpack.c.bf16 %v1034_v32, %v1033_v31  ;;  %v685_v57 = vpack.c.bf16 %v3142_v19, %v3139_v17  ;;  %v1064_v59 = vpack.c.bf16 %v1046_v43, %v1045_v21 }
  0xac   : > { %v1057_v58 = vpack.c.bf16 %v1032_v41, %v1031_v25  ;;  %v651_v1 = vmul.f32 %v584_v47, %v3093_v40  ;;  %v652_v2 = vmul.f32 %v584_v47, %v3099_v45  ;;  %v3201_v5 = vand.u32 2147483647, %v1536_v38 }
  0xad   : > { %2258 = vmatpush3.bf16.msra.mxu0 %v680_v48  ;;  %2286 = vmatpush3.bf16.msra.mxu1 %v1058_v52  ;;  %v1029_v53 = vmul.f32 %v962_v55, %v3105_v50  ;;  %v1030_v54 = vmul.f32 %v962_v55, %v3107_v51  ;;  %v990_v62 = vrot.slane %v920_v27, %v3085_v36  ;;  %v1183_v17 = vsub.f32 1.0, %v3087_v37 }
  0xae   : > { %2259 = vmatprep.subr.bf16.mxu0 %v687_v34  ;;  %2287 = vmatprep.subr.bf16.mxu1 %v1065_v20  ;;  %v678_v19 = vpack.c.bf16 %v652_v2, %v651_v1  ;;  %v580_v6 = vrot.slane %v493_v46, %v3085_v36  ;;  %v958_v11 = vrot.slane %v871_v49, %v3085_v36  ;;  %v3221_v49 = vmax.f32 %v1182_v42, 0.0 }
  0xaf   : > { %v1056_v12 = vpack.c.bf16 %v1030_v54, %v1029_v53  ;;  %v1043_v38 = vmul.f32 %v990_v62, %v3105_v50  ;;  %v1044_v13 = vmul.f32 %v990_v62, %v3107_v51  ;;  %v608_v14 = vrot.slane %v559_v9, %v3085_v36 }
  0xb0   : > { %v649_v27 = vmul.f32 %v580_v6, %v3093_v40  ;;  %v650_v34 = vmul.f32 %v580_v6, %v3099_v45  ;;  %v1027_v15 = vmul.f32 %v958_v11, %v3105_v50  ;;  %v1028_v46 = vmul.f32 %v958_v11, %v3107_v51 }
  0xb1   : > { %2260 = vmatpush3.bf16.msra.mxu0 %v679_v35  ;;  %2288 = vmatpush3.bf16.msra.mxu1 %v1057_v58  ;;  %v1063_v16 = vpack.c.bf16 %v1044_v13, %v1043_v38  ;;  %v663_v20 = vmul.f32 %v608_v14, %v3093_v40  ;;  %v664_v21 = vmul.f32 %v608_v14, %v3099_v45  ;;  %v1192_v35 = vand.u32 2147483647, %v1190_v56 }
  0xb2   : > { %2261 = vmatprep.subr.bf16.mxu0 %v686_v61  ;;  %2289 = vmatprep.subr.bf16.mxu1 %v1064_v59  ;;  %v677_v9 = vpack.c.bf16 %v650_v34, %v649_v27  ;;  %v1055_v22 = vpack.c.bf16 %v1028_v46, %v1027_v15  ;;  %v905_v23 = vcombine.high %v3129_v10, %v3129_v10 }
  0xb3   : > { %v684_v42 = vpack.c.bf16 %v664_v21, %v663_v20  ;;  %v470_v24 = vrot.slane %v3122_v7, %v3083_v33  ;;  %v848_v25 = vrot.slane %v3124_v8, %v3083_v33  ;;  %v557_v61 = vcombine.high %v3113_v60, %v3113_v60 }
  0xb4   : > { %v927_v28 = vrot.slane %v905_v23, %v3083_v33  ;;  %v3241_v30 = vrot.slane %v3129_v10, %v3083_v33  ;;  %v600_v0 = vrot.slane %v3116_v63, %v3085_v36  ;;  %v3247_v31 = vrot.slane %v3113_v60, %v3085_v36 }
  0xb5   : > { %2262 = vmatpush3.bf16.msra.mxu0 %v678_v19  ;;  %2290 = vmatpush3.bf16.msra.mxu1 %v1056_v12  ;;  %v478_v7 = vcombine.high %v470_v24, %v470_v24  ;;  %v856_v8 = vcombine.high %v848_v25, %v848_v25  ;;  %v604_v32 = vrot.slane %v557_v61, %v3085_v36  ;;  %v1195_v60 = vsub.f32 1.0, %v3230_v29 }
  0xb6   : > { %2263 = vmatprep.subr.bf16.mxu0 %v685_v57  ;;  %2291 = vmatprep.subr.bf16.mxu1 %v1063_v16  ;;  %v937_v10 = vcombine.high %v927_v28, %v927_v28  ;;  %v935_v63 = vcombine.high %v3241_v30, %v3241_v30  ;;  %v3256_v41 = vrot.slane %v470_v24, %v3083_v33  ;;  %v1194_v2 = vsub.f32 1.0, %v1192_v35 }
  0xb7   : > { %v500_v43 = vrot.slane %v478_v7, %v3083_v33  ;;  %v878_v47 = vrot.slane %v856_v8, %v3083_v33  ;;  %v661_v48 = vmul.f32 %v604_v32, %v3093_v40  ;;  %v662_v44 = vmul.f32 %v604_v32, %v3099_v45 }
  0xb8   : > { %v986_v56 = vrot.slane %v937_v10, %v3085_v36  ;;  %v982_v52 = vrot.slane %v935_v63, %v3085_v36  ;;  %v508_v55 = vcombine.high %v3256_v41, %v3256_v41  ;;  %v864_v57 = vrot.slane %v848_v25, %v3083_v33 }
  0xb9   : > { %2264 = vmatpush3.bf16.msra.mxu0 %v677_v9  ;;  %2292 = vmatpush3.bf16.msra.mxu1 %v1055_v22  ;;  %v510_v58 = vcombine.high %v500_v43, %v500_v43  ;;  %v888_v59 = vcombine.high %v878_v47, %v878_v47  ;;  %v683_v1 = vpack.c.bf16 %v662_v44, %v661_v48  ;;  %v1197_v63 = vmax.f32 %v1195_v60, 0.0 }
  0xba   : > { %2265 = vmatprep.subr.bf16.mxu0 %v684_v42  ;;  %v1041_v53 = vmul.f32 %v986_v56, %v3105_v50  ;;  %v1042_v54 = vmul.f32 %v986_v56, %v3107_v51  ;;  %v1039_v62 = vmul.f32 %v982_v52, %v3105_v50  ;;  %v1040_v19 = vmul.f32 %v982_v52, %v3107_v51 }
  0xbb   : > { %v576_v6 = vrot.slane %v510_v58, %v3085_v36  ;;  %v954_v11 = vrot.slane %v888_v59, %v3085_v36  ;;  %v572_v12 = vrot.slane %v508_v55, %v3085_v36  ;;  %v886_v38 = vcombine.high %v864_v57, %v864_v57 }
  0xbc   : > { %v1062_v13 = vpack.c.bf16 %v1042_v54, %v1041_v53  ;;  %v1061_v14 = vpack.c.bf16 %v1040_v19, %v1039_v62  ;;  %v659_v27 = vmul.f32 %v600_v0, %v3093_v40  ;;  %v660_v34 = vmul.f32 %v600_v0, %v3099_v45  ;;  %v2241_v19 = vld [vmem:[%s3041_s22 + $0x7] ss:$0 sm:$0xff] }
  0xbd   : > { %v647_v15 = vmul.f32 %v576_v6, %v3093_v40  ;;  %v648_v46 = vmul.f32 %v576_v6, %v3099_v45  ;;  %v1025_v16 = vmul.f32 %v954_v11, %v3105_v50  ;;  %v1026_v20 = vmul.f32 %v954_v11, %v3107_v51 }
  0xbe   : > { %2293 = vmatprep.subr.bf16.mxu1 %v1062_v13  ;;  %v645_v21 = vmul.f32 %v572_v12, %v3093_v40  ;;  %v646_v9 = vmul.f32 %v572_v12, %v3099_v45  ;;  %v950_v22 = vrot.slane %v886_v38, %v3085_v36  ;;  %v682_v23 = vpack.c.bf16 %v660_v34, %v659_v27 }
  0xbf   : > { %v676_v29 = vpack.c.bf16 %v648_v46, %v647_v15  ;;  %v1054_v42 = vpack.c.bf16 %v1026_v20, %v1025_v16  ;;  %v978_v24 = vrot.slane %v927_v28, %v3085_v36  ;;  %v568_v25 = vrot.slane %v500_v43, %v3085_v36  ;;  %v3334_v46 = vld [vmem:[%s3058_s0] ss:$8 sps:$4 sm:$0xff]  }
  0xc0   : > { %v675_v61 = vpack.c.bf16 %v646_v9, %v645_v21  ;;  %v1023_v0 = vmul.f32 %v950_v22, %v3105_v50  ;;  %v1024_v7 = vmul.f32 %v950_v22, %v3107_v51  ;;  %v946_v8 = vrot.slane %v878_v47, %v3085_v36 }
  0xc1   : > { %2266 = vmatpush3.bf16.msra.mxu0 %v676_v29  ;;  %2294 = vmatpush3.bf16.msra.mxu1 %v1054_v42  ;;  %v1037_v32 = vmul.f32 %v978_v24, %v3105_v50  ;;  %v1038_v35 = vmul.f32 %v978_v24, %v3107_v51  ;;  %v643_v10 = vmul.f32 %v568_v25, %v3093_v40  ;;  %v1196_v44 = vmax.f32 %v1194_v2, 0.0  ;;  %v3345_v24 = vld [vmem:[%s3058_s0 + $0x14] ss:$8 sps:$4 sm:$0xff]  }
  0xc2   : > { %2267 = vmatprep.subr.bf16.mxu0 %v683_v1  ;;  %2295 = vmatprep.subr.bf16.mxu1 %v1061_v14  ;;  %v1053_v28 = vpack.c.bf16 %v1024_v7, %v1023_v0  ;;  %v644_v43 = vmul.f32 %v568_v25, %v3099_v45  ;;  %v1021_v48 = vmul.f32 %v946_v8, %v3105_v50  ;;  %v1539_v2 = vand.u32 2147483647, %v1537_v39 }
  0xc3   : > { %v1060_v56 = vpack.c.bf16 %v1038_v35, %v1037_v32  ;;  %v1022_v47 = vmul.f32 %v946_v8, %v3107_v51  ;;  %v657_v52 = vmul.f32 %v3247_v31, %v3093_v40  ;;  %v658_v55 = vmul.f32 %v3247_v31, %v3099_v45 }
  0xc4   : > { %v674_v58 = vpack.c.bf16 %v644_v43, %v643_v10  ;;  %v974_v60 = vrot.slane %v3241_v30, %v3085_v36  ;;  %v564_v59 = vrot.slane %v3256_v41, %v3085_v36  ;;  %v942_v1 = vrot.slane %v864_v57, %v3085_v36 }
  0xc5   : > { %2268 = vmatpush3.bf16.msra.mxu0 %v675_v61  ;;  %2296 = vmatpush3.bf16.msra.mxu1 %v1053_v28  ;;  %v1052_v53 = vpack.c.bf16 %v1022_v47, %v1021_v48  ;;  %v681_v54 = vpack.c.bf16 %v658_v55, %v657_v52  ;;  %v1249_v62 = vcombine.high %v1197_v63, %v1197_v63  ;;  %v3310_v31 = vmax.f32 %v1183_v17, 0.0 }
  0xc6   : > { %2269 = vmatprep.subr.bf16.mxu0 %v682_v23  ;;  %2297 = vmatprep.subr.bf16.mxu1 %v1060_v56  ;;  %v1035_v30 = vmul.f32 %v974_v60, %v3105_v50  ;;  %v1036_v41 = vmul.f32 %v974_v60, %v3107_v51  ;;  %v641_v57 = vmul.f32 %v564_v59, %v3093_v40  ;;  %v1540_v13 = vsub.f32 1.0, %v3201_v5 }
  0xc7   : > { %v642_v26 = vmul.f32 %v564_v59, %v3099_v45  ;;  %v1019_v39 = vmul.f32 %v942_v1, %v3105_v50  ;;  %v1020_v6 = vmul.f32 %v942_v1, %v3107_v51  ;;  %v1263_v11 = vrot.slane %v1249_v62, %v3083_v33 }
  0xc8   : > { %v1059_v12 = vpack.c.bf16 %v1036_v41, %v1035_v30  ;;  %v1548_v37 = vsub.f32 %v2241_v19, %v3054_v3  ;;  %v1549_v17 = vsub.f32 %v2241_v19, %v3056_v4  ;;  %v1200_v38 = vcombine.high %v1196_v44, %v1196_v44 }
  0xc9   : > { %2270 = vmatpush3.bf16.msra.mxu0 %v674_v58  ;;  %2298 = vmatpush3.bf16.msra.mxu1 %v1052_v53  ;;  %v673_v40 = vpack.c.bf16 %v642_v26, %v641_v57  ;;  %v1051_v14 = vpack.c.bf16 %v1020_v6, %v1019_v39  ;;  %v1265_v45 = vcombine.high %v1263_v11, %v1263_v11  ;;  %v1541_v3 = vsub.f32 1.0, %v1539_v2 }
  0xca   : > { %2271 = vmatprep.subr.bf16.mxu0 %v681_v54  ;;  %2299 = vmatprep.subr.bf16.mxu1 %v1059_v12  ;;  %v1550_v50 = vand.u32 2147483647, %v1548_v37  ;;  %v1551_v51 = vand.u32 2147483647, %v1549_v17  ;;  %v1214_v27 = vrot.slane %v1200_v38, %v3083_v33  ;;  %v3324_v34 = vrot.slane %v1263_v11, %v3083_v33  ;;  %v3393_v38 = vld [vmem:[%s3058_s0 + $0x10] ss:$8 sps:$4 sm:$0xff]  }
  0xcb   : > { %v1293_v4 = vrot.slane %v1265_v45, %v3083_v33  ;;  %v3328_v5 = vrot.slane %v1197_v63, %v3083_v33  ;;  %v3331_v15 = vrot.slane %v1196_v44, %v3083_v33  ;;  %v3338_v22 = vmax.f32 %v1540_v13, 0.0 }
  0xcc   : > { %v1553_v16 = vsub.f32 1.0, %v1551_v51  ;;  %v1216_v20 = vcombine.high %v1214_v27, %v1214_v27  ;;  %v1552_v21 = vsub.f32 1.0, %v1550_v50  ;;  %v1295_v9 = vcombine.high %v3324_v34, %v3324_v34 }
  0xcd   : > { %2272 = vmatpush3.bf16.msra.mxu0 %v673_v40  ;;  %2300 = vmatpush3.bf16.msra.mxu1 %v1051_v14  ;;  %v1297_v23 = vcombine.high %v1293_v4, %v1293_v4  ;;  %v3341_v29 = vrot.slane %v1214_v27, %v3083_v33  ;;  %v1353_v42 = vrot.slane %v1293_v4, %v3085_v36  ;;  %v3362_v63 = vmax.f32 %v1541_v3, 0.0 }
  0xce   : > { %v3347_v25 = vmax.f32 %v1553_v16, 0.0  ;;  %v1244_v61 = vrot.slane %v1216_v20, %v3083_v33  ;;  %v3350_v0 = vmax.f32 %v1552_v21, 0.0  ;;  %v1357_v7 = vrot.slane %v1295_v9, %v3085_v36 }
  0xcf   : > { %v1361_v8 = vrot.slane %v1297_v23, %v3085_v36  ;;  %v1246_v32 = vcombine.high %v3341_v29, %v3341_v29  ;;  %v3357_v35 = vmul.f32 %v1353_v42, %v3221_v49  ;;  %v3360_v10 = vmul.f32 %v1353_v42, %v3310_v31 }
  0xd0   : > { %742 = vmatmul.mubr.bf16.vlgmr.msra.gmra.mxu0 %v3334_v46  ;;  %1100 = vmatmul.mubr.bf16.vlgmr.msra.gmra.mxu1 %v3334_v46  ;;  %v1607_v28 = vcombine.high %v3347_v25, %v3347_v25  ;;  %v1248_v43 = vcombine.high %v1244_v61, %v1244_v61  ;;  %v1558_v48 = vcombine.high %v3350_v0, %v3350_v0 }
  0xd1   : > { %v1408_v44 = vmul.f32 %v1361_v8, %v3221_v49  ;;  %v1409_v56 = vmul.f32 %v1361_v8, %v3310_v31  ;;  %v1406_v47 = vmul.f32 %v1357_v7, %v3221_v49  ;;  %v1407_v52 = vmul.f32 %v1357_v7, %v3310_v31  ;;  %749 = vmatprep.mubr.bf16.mxu0 %v3345_v24 }
  0xd2   : > { %v1621_v55 = vrot.slane %v1607_v28, %v3083_v33  ;;  %v1329_v58 = vrot.slane %v1248_v43, %v3085_v36  ;;  %v1572_v60 = vrot.slane %v1558_v48, %v3083_v33  ;;  %v1325_v59 = vrot.slane %v1246_v32, %v3085_v36  ;;  %1107 = vmatprep.mubr.bf16.mxu1 %v3345_v24 }
  0xd3   : > { %v1425_v1 = vpack.c.bf16 %v1409_v56, %v1408_v44  ;;  %v1424_v2 = vpack.c.bf16 %v1407_v52, %v1406_v47  ;;  %v1423_v53 = vpack.c.bf16 %v3360_v10, %v3357_v35  ;;  %v1321_v54 = vrot.slane %v1244_v61, %v3085_v36 }
  0xd4   : > { %v1623_v62 = vcombine.high %v1621_v55, %v1621_v55  ;;  %v1392_v19 = vmul.f32 %v1329_v58, %v3221_v49  ;;  %v1393_v30 = vmul.f32 %v1329_v58, %v3310_v31  ;;  %v1574_v41 = vcombine.high %v1572_v60, %v1572_v60 }
  0xd5   : > { %2313 = vmatprep.subr.bf16.mxu0 %v1425_v1  ;;  %v1637_v57 = vrot.slane %v1621_v55, %v3083_v33  ;;  %v1390_v26 = vmul.f32 %v1325_v59, %v3221_v49  ;;  %v1391_v39 = vmul.f32 %v1325_v59, %v3310_v31  ;;  %v1588_v6 = vrot.slane %v1572_v60, %v3083_v33 }
  0xd6   : > { %v1651_v11 = vrot.slane %v1623_v62, %v3083_v33  ;;  %v1417_v12 = vpack.c.bf16 %v1393_v30, %v1392_v19  ;;  %v1602_v37 = vrot.slane %v1574_v41, %v3083_v33  ;;  %v1388_v17 = vmul.f32 %v1321_v54, %v3221_v49 }
  0xd7   : > { %v1653_v13 = vcombine.high %v1637_v57, %v1637_v57  ;;  %v1416_v40 = vpack.c.bf16 %v1391_v39, %v1390_v26  ;;  %v1604_v14 = vcombine.high %v1588_v6, %v1588_v6  ;;  %v1389_v45 = vmul.f32 %v1321_v54, %v3310_v31 }
  0xd8   : > { %v1655_v50 = vcombine.high %v1651_v11, %v1651_v11  ;;  %2314 = vmatpush3.bf16.msra.mxu0 %v1417_v12  ;;  %v1606_v51 = vcombine.high %v1602_v37, %v1602_v37  ;;  %v1711_v27 = vrot.slane %v1651_v11, %v3085_v36  ;;  %v1679_v3 = vrot.slane %v1602_v37, %v3085_v36 }
  0xd9   : > { %2315 = vmatprep.subr.bf16.mxu0 %v1424_v2  ;;  %v1715_v4 = vrot.slane %v1653_v13, %v3085_v36  ;;  %v1683_v16 = vrot.slane %v1604_v14, %v3085_v36  ;;  %v1415_v20 = vpack.c.bf16 %v1389_v45, %v1388_v17  ;;  %v1349_v21 = vrot.slane %v3324_v34, %v3085_v36 }
  0xda   : > { %v1719_v9 = vrot.slane %v1655_v50, %v3085_v36  ;;  %v1687_v23 = vrot.slane %v1606_v51, %v3085_v36  ;;  %v1762_v42 = vmul.f32 %v1711_v27, %v3338_v22  ;;  %v1763_v61 = vmul.f32 %v1711_v27, %v3362_v63  ;;  %750 = vmatmul.mubr.bf16.gmra.mxu0 %v3393_v38 }
  0xdb   : > { %v1764_v7 = vmul.f32 %v1715_v4, %v3338_v22  ;;  %v1765_v8 = vmul.f32 %v1715_v4, %v3362_v63  ;;  %v1748_v32 = vmul.f32 %v1683_v16, %v3338_v22  ;;  %v1749_v35 = vmul.f32 %v1683_v16, %v3362_v63  ;;  %1108 = vmatmul.mubr.bf16.gmra.mxu1 %v3393_v38 }
  0xdc   : > { %v1766_v34 = vmul.f32 %v1719_v9, %v3338_v22  ;;  %v1767_v10 = vmul.f32 %v1719_v9, %v3362_v63  ;;  %v1750_v28 = vmul.f32 %v1687_v23, %v3338_v22  ;;  %v1751_v43 = vmul.f32 %v1687_v23, %v3362_v63  ;;  %2316 = vmatpush3.bf16.msra.mxu0 %v1416_v40 }
  0xdd   : > { %v1782_v48 = vpack.c.bf16 %v1765_v8, %v1764_v7  ;;  %v1774_v44 = vpack.c.bf16 %v1749_v35, %v1748_v32  ;;  %2317 = vmatprep.subr.bf16.mxu0 %v1423_v53  ;;  %v1781_v56 = vpack.c.bf16 %v1763_v61, %v1762_v42  ;;  %v1746_v47 = vmul.f32 %v1679_v3, %v3338_v22 }
  0xde   : > { %v1783_v52 = vpack.c.bf16 %v1767_v10, %v1766_v34  ;;  %v1775_v55 = vpack.c.bf16 %v1751_v43, %v1750_v28  ;;  %v1747_v58 = vmul.f32 %v1679_v3, %v3362_v63  ;;  %v1402_v60 = vmul.f32 %v1349_v21, %v3221_v49  ;;  %1458 = vmatprep.mubr.bf16.mxu0 %v3072_v18 }
  0xdf   : > { %v1403_v59 = vmul.f32 %v1349_v21, %v3310_v31  ;;  %v1707_v1 = vrot.slane %v1637_v57, %v3085_v36  ;;  %v1317_v2 = vrot.slane %v3341_v29, %v3085_v36  ;;  %v1675_v53 = vrot.slane %v1588_v6, %v3085_v36  ;;  %1816 = vmatprep.mubr.bf16.mxu1 %v3072_v18 }
  0xe0   : > { %2341 = vmatprep.subr.bf16.mxu1 %v1783_v52  ;;  %2318 = vmatpush3.bf16.msra.mxu0 %v1415_v20  ;;  %v1773_v54 = vpack.c.bf16 %v1747_v58, %v1746_v47  ;;  %v1264_v62 = vcombine.high %v3328_v5, %v3328_v5  ;;  %v1614_v19 = vrot.slane %v3347_v25, %v3083_v33 }
  0xe1   : > { %2342 = vmatpush3.bf16.msra.mxu1 %v1775_v55  ;;  %v1422_v30 = vpack.c.bf16 %v1403_v59, %v1402_v60  ;;  %v1760_v41 = vmul.f32 %v1707_v1, %v3338_v22  ;;  %v1761_v57 = vmul.f32 %v1707_v1, %v3362_v63  ;;  %v1386_v29 = vmul.f32 %v1317_v2, %v3221_v49 }
  0xe2   : > { %2343 = vmatprep.subr.bf16.mxu1 %v1782_v48  ;;  %v1387_v18 = vmul.f32 %v1317_v2, %v3310_v31  ;;  %v1744_v26 = vmul.f32 %v1675_v53, %v3338_v22  ;;  %v1745_v39 = vmul.f32 %v1675_v53, %v3362_v63  ;;  %v1286_v6 = vrot.slane %v1264_v62, %v3083_v33 }
  0xe3   : > { %2319 = vmatprep.subr.bf16.mxu0 %v1422_v30  ;;  %v1780_v11 = vpack.c.bf16 %v1761_v57, %v1760_v41  ;;  %v1622_v25 = vcombine.high %v1614_v19, %v1614_v19  ;;  %v1215_v12 = vcombine.high %v3331_v15, %v3331_v15  ;;  %v1565_v37 = vrot.slane %v3350_v0, %v3083_v33 }
  0xe4   : > { %v1414_v17 = vpack.c.bf16 %v1387_v18, %v1386_v29  ;;  %v1772_v13 = vpack.c.bf16 %v1745_v39, %v1744_v26  ;;  %v1296_v40 = vcombine.high %v1286_v6, %v1286_v6  ;;  %v3443_v14 = vrot.slane %v3328_v5, %v3083_v33 }
  0xe5   : > { %2344 = vmatpush3.bf16.msra.mxu1 %v1774_v44  ;;  %v1644_v45 = vrot.slane %v1622_v25, %v3083_v33  ;;  %v1237_v50 = vrot.slane %v1215_v12, %v3083_v33  ;;  %v1573_v51 = vcombine.high %v1565_v37, %v1565_v37  ;;  %v3448_v27 = vrot.slane %v1614_v19, %v3083_v33 }
  0xe6   : > { %2345 = vmatprep.subr.bf16.mxu1 %v1781_v56  ;;  %2320 = vmatpush3.bf16.msra.mxu0 %v1414_v17  ;;  %v1345_v0 = vrot.slane %v1296_v40, %v3085_v36  ;;  %v1294_v3 = vcombine.high %v3443_v14, %v3443_v14  ;;  %v3455_v5 = vrot.slane %v3331_v15, %v3083_v33 }
  0xe7   : > { %v1654_v4 = vcombine.high %v1644_v45, %v1644_v45  ;;  %v1247_v16 = vcombine.high %v1237_v50, %v1237_v50  ;;  %v1595_v20 = vrot.slane %v1573_v51, %v3083_v33  ;;  %v1652_v21 = vcombine.high %v3448_v27, %v3448_v27 }
  0xe8   : > { %v1400_v9 = vmul.f32 %v1345_v0, %v3221_v49  ;;  %v1401_v23 = vmul.f32 %v1345_v0, %v3310_v31  ;;  %v1341_v42 = vrot.slane %v1294_v3, %v3085_v36  ;;  %v1245_v61 = vcombine.high %v3455_v5, %v3455_v5 }
  0xe9   : > { %2346 = vmatpush3.bf16.msra.mxu1 %v1773_v54  ;;  %v1703_v15 = vrot.slane %v1654_v4, %v3085_v36  ;;  %v1313_v7 = vrot.slane %v1247_v16, %v3085_v36  ;;  %v1605_v8 = vcombine.high %v1595_v20, %v1595_v20  ;;  %v1699_v32 = vrot.slane %v1652_v21, %v3085_v36 }
  0xea   : > { %2347 = vmatprep.subr.bf16.mxu1 %v1780_v11  ;;  %v1421_v35 = vpack.c.bf16 %v1401_v23, %v1400_v9  ;;  %v1398_v34 = vmul.f32 %v1341_v42, %v3221_v49  ;;  %v1399_v10 = vmul.f32 %v1341_v42, %v3310_v31  ;;  %v1309_v28 = vrot.slane %v1245_v61, %v3085_v36 }
  0xeb   : > { %v1758_v43 = vmul.f32 %v1703_v15, %v3338_v22  ;;  %v1759_v48 = vmul.f32 %v1703_v15, %v3362_v63  ;;  %v1384_v44 = vmul.f32 %v1313_v7, %v3221_v49  ;;  %v1385_v56 = vmul.f32 %v1313_v7, %v3310_v31 }
  0xec   : > { %2321 = vmatprep.subr.bf16.mxu0 %v1421_v35  ;;  %v1671_v47 = vrot.slane %v1605_v8, %v3085_v36  ;;  %v1420_v52 = vpack.c.bf16 %v1399_v10, %v1398_v34  ;;  %v1756_v55 = vmul.f32 %v1699_v32, %v3338_v22  ;;  %v1757_v58 = vmul.f32 %v1699_v32, %v3362_v63 }
  0xed   : > { %2348 = vmatpush3.bf16.msra.mxu1 %v1772_v13  ;;  %v1779_v60 = vpack.c.bf16 %v1759_v48, %v1758_v43  ;;  %v1413_v59 = vpack.c.bf16 %v1385_v56, %v1384_v44  ;;  %v1382_v1 = vmul.f32 %v1309_v28, %v3221_v49  ;;  %v1383_v2 = vmul.f32 %v1309_v28, %v3310_v31  ;;  %v758_v56 = vld [vmem:[%s3047_s24] sm:$0x3] }
  0xee   : > { %v1742_v53 = vmul.f32 %v1671_v47, %v3338_v22  ;;  %v1743_v54 = vmul.f32 %v1671_v47, %v3362_v63  ;;  %v1778_v62 = vpack.c.bf16 %v1757_v58, %v1756_v55  ;;  %v1581_v19 = vrot.slane %v1565_v37, %v3083_v33 }
  0xef   : > { %2349 = vmatprep.subr.bf16.mxu1 %v1779_v60  ;;  %2322 = vmatpush3.bf16.msra.mxu0 %v1413_v59  ;;  %v1412_v30 = vpack.c.bf16 %v1383_v2, %v1382_v1  ;;  %v1337_v41 = vrot.slane %v1286_v6, %v3085_v36  ;;  %v1695_v57 = vrot.slane %v1644_v45, %v3085_v36  ;;  %v759_v55 = vunpack.c.l.bf16 %v758_v56  ;;  %v1833_v60 = vld [vmem:[%s3047_s24 + $0x4] sm:$0xc] }
  0xf0   : > { %v1771_v29 = vpack.c.bf16 %v1743_v54, %v1742_v53  ;;  %2323 = vmatprep.subr.bf16.mxu0 %v1420_v52  ;;  %v1603_v18 = vcombine.high %v1581_v19, %v1581_v19  ;;  %v1305_v26 = vrot.slane %v1237_v50, %v3085_v36  ;;  %v1663_v39 = vrot.slane %v1595_v20, %v3085_v36 }
  0xf1   : > { %v1396_v11 = vmul.f32 %v1337_v41, %v3221_v49  ;;  %v1397_v25 = vmul.f32 %v1337_v41, %v3310_v31  ;;  %v1754_v12 = vmul.f32 %v1695_v57, %v3338_v22  ;;  %v1755_v37 = vmul.f32 %v1695_v57, %v3362_v63 }
  0xf2   : > { %2350 = vmatpush3.bf16.msra.mxu1 %v1771_v29  ;;  %v1667_v6 = vrot.slane %v1603_v18, %v3085_v36  ;;  %v1380_v17 = vmul.f32 %v1305_v26, %v3221_v49  ;;  %v1381_v13 = vmul.f32 %v1305_v26, %v3310_v31  ;;  %v1738_v40 = vmul.f32 %v1663_v39, %v3338_v22 }
  0xf3   : > { %2351 = vmatprep.subr.bf16.mxu1 %v1778_v62  ;;  %2324 = vmatpush3.bf16.msra.mxu0 %v1412_v30  ;;  %v1419_v45 = vpack.c.bf16 %v1397_v25, %v1396_v11  ;;  %v1777_v50 = vpack.c.bf16 %v1755_v37, %v1754_v12  ;;  %v1739_v51 = vmul.f32 %v1663_v39, %v3362_v63  ;;  %v1834_v2 = vunpack.c.l.bf16 %v1833_v60 }
  0xf4   : > { %v1740_v0 = vmul.f32 %v1667_v6, %v3338_v22  ;;  %v1741_v3 = vmul.f32 %v1667_v6, %v3362_v63  ;;  %v1411_v4 = vpack.c.bf16 %v1381_v13, %v1380_v17  ;;  %v1333_v16 = vrot.slane %v3443_v14, %v3085_v36 }
  0xf5   : > { %2325 = vmatprep.subr.bf16.mxu0 %v1419_v45  ;;  %v1769_v20 = vpack.c.bf16 %v1739_v51, %v1738_v40  ;;  %v1691_v21 = vrot.slane %v3448_v27, %v3085_v36  ;;  %v1301_v9 = vrot.slane %v3455_v5, %v3085_v36  ;;  %v1659_v23 = vrot.slane %v1581_v19, %v3085_v36 }
  0xf6   : > { %v1770_v42 = vpack.c.bf16 %v1741_v3, %v1740_v0  ;;  %v1394_v61 = vmul.f32 %v1333_v16, %v3221_v49  ;;  %v1395_v15 = vmul.f32 %v1333_v16, %v3310_v31  ;;  %v1836_v57 = vcombine.high %v1834_v2, %v1834_v2 }
  0xf7   : > { %2326 = vmatpush3.bf16.msra.mxu0 %v1411_v4  ;;  %v1752_v7 = vmul.f32 %v1691_v21, %v3338_v22  ;;  %v1753_v14 = vmul.f32 %v1691_v21, %v3362_v63  ;;  %v1378_v8 = vmul.f32 %v1301_v9, %v3221_v49  ;;  %v1379_v32 = vmul.f32 %v1301_v9, %v3310_v31 }
  0xf8   : > { %2352 = vmatpush3.bf16.msra.mxu1 %v1770_v42  ;;  %v1418_v27 = vpack.c.bf16 %v1395_v15, %v1394_v61  ;;  %v1736_v5 = vmul.f32 %v1659_v23, %v3338_v22  ;;  %v1737_v35 = vmul.f32 %v1659_v23, %v3362_v63  ;;  %v1116_v63 = vld [vmem:[%s3047_s24] sm:$0xc]  ;;  %v1843_v6 = vrot.slane %v1836_v57, %v3083_v33 }
  0xf9   : > { %2353 = vmatprep.subr.bf16.mxu1 %v1777_v50  ;;  %v1776_v34 = vpack.c.bf16 %v1753_v14, %v1752_v7  ;;  %v1410_v10 = vpack.c.bf16 %v1379_v32, %v1378_v8  ;;  %v1117_v44 = vunpack.c.l.bf16 %v1116_v63 }
  0xfa   : > { %2327 = vmatprep.subr.bf16.mxu0 %v1418_v27  ;;  %v1768_v28 = vpack.c.bf16 %v1737_v35, %v1736_v5  ;;  %v1844_v0 = vcombine.high %v1843_v6, %v1843_v6  ;;  %v1851_v8 = vrot.slane %v1843_v6, %v3083_v33 }
  0xfb   : > { %2328 = vmatpush3.bf16.msra.mxu0 %v1410_v10 }
  0xfc   : > { %2354 = vmatpush3.bf16.msra.mxu1 %v1769_v20 }
  0xfd   : > { %2355 = vmatprep.subr.bf16.mxu1 %v1776_v34  ;;  %v1858_v34 = vrot.slane %v1844_v0, %v3083_v33 }
  0xfe   : > { %1459 = vmatmul.mubr.bf16.vlgmr.msra.gmra.mxu0 %v3334_v46 }
  0xff   : > { %1466 = vmatprep.mubr.bf16.mxu0 %v3345_v24 }
 0x100   : > { %2356 = vmatpush3.bf16.msra.mxu1 %v1768_v28 }
 0x103   : > { %1817 = vmatmul.mubr.bf16.vlgmr.msra.gmra.mxu1 %v3334_v46  ;;  %v1119_v46 = vcombine.high %v1117_v44, %v1117_v44 }
 0x104   : > { %1824 = vmatprep.mubr.bf16.mxu1 %v3345_v24  ;;  %v1475_v24 = vld [vmem:[%s3047_s24 + $0x4] sm:$0x3] }
 0x105   : > { %v1476_v1 = vunpack.c.l.bf16 %v1475_v24  ;;  %v1126_v53 = vrot.slane %v1119_v46, %v3083_v33 }
 0x106   : > { %1467 = vmatmul.mubr.bf16.gmra.mxu0 %v3393_v38 }
 0x107   : > { %v1127_v30 = vcombine.high %v1126_v53, %v1126_v53  ;;  %v1484_v41 = vrot.slane %v1476_v1, %v3083_v33  ;;  %v1134_v18 = vrot.slane %v1126_v53, %v3083_v33  ;;  %v1868_v1 = vrot.slane %v1858_v34, %v3085_v36 }
 0x109   : > { %v1485_v25 = vcombine.high %v1484_v41, %v1484_v41  ;;  %v1141_v12 = vrot.slane %v1127_v30, %v3083_v33  ;;  %v1492_v37 = vrot.slane %v1484_v41, %v3083_v33  ;;  %v1147_v45 = vrot.slane %v1134_v18, %v3085_v36 }
 0x10a   : > { %v1142_v7 = vcombine.high %v1134_v18, %v1134_v18 }
 0x10b   : > { %1825 = vmatmul.mubr.bf16.gmra.mxu1 %v3393_v38  ;;  %v767_v38 = vrot.slane %v759_v55, %v3083_v33  ;;  %v1499_v20 = vrot.slane %v1485_v25, %v3083_v33  ;;  %v1151_v23 = vrot.slane %v1141_v12, %v3085_v36  ;;  %v1505_v42 = vrot.slane %v1492_v37, %v3085_v36 }
 0x10c   : > { %v1143_v5 = vcombine.high %v1141_v12, %v1141_v12  ;;  %v1864_v55 = vrot.slane %v1851_v8, %v3085_v36 }
 0x10d   : > { %v768_v19 = vcombine.high %v767_v38, %v767_v38  ;;  %v775_v29 = vrot.slane %v767_v38, %v3083_v33  ;;  %v1501_v57 = vcombine.high %v1499_v20, %v1499_v20 }
 0x10e   : > { %v1159_v24 = vrot.slane %v1143_v5, %v3085_v36 }
 0x10f   : > { %v782_v11 = vrot.slane %v768_v19, %v3083_v33  ;;  %v788_v13 = vrot.slane %v775_v29, %v3085_v36  ;;  %v783_v4 = vcombine.high %v775_v29, %v775_v29 }
 0x111   : > { %v792_v3 = vrot.slane %v782_v11, %v3085_v36  ;;  %v784_v32 = vcombine.high %v782_v11, %v782_v11  ;;  %v796_v10 = vrot.slane %v783_v4, %v3085_v36  ;;  %v1517_v4 = vrot.slane %v1501_v57, %v3085_v36 }
 0x113   : > { %v800_v33 = vrot.slane %v784_v32, %v3085_v36 }
 0x190   : > { %v2273_v49 = vpop.f32.mrf.mxu0  ;;  %v2301_v22 = vpop.f32.mrf.mxu1 }
 0x192   : > { %v2274_v31 = vpop.f32.mrf.mxu0  ;;  %v2302_v48 = vpop.f32.mrf.mxu1 }
 0x193   : > { %v2275_v17 = vadd.f32 %v2274_v31, %v2273_v49  ;;  %v2303_v40 = vadd.f32 %v2302_v48, %v2301_v22  ;;  %v1509_v49 = vrot.slane %v1499_v20, %v3085_v36  ;;  %v1500_v31 = vcombine.high %v1492_v37, %v1492_v37 }
 0x194   : > { %v2276_v43 = vpop.f32.mrf.mxu0  ;;  %v2304_v52 = vpop.f32.mrf.mxu1 }
 0x195   : > { %v805_v61 = vmul.f32 %v2275_v17, %v788_v13  ;;  %v1164_v15 = vmul.f32 %v2303_v40, %v1147_v45  ;;  %v1513_v53 = vrot.slane %v1500_v31, %v3085_v36 }
 0x196   : > { %v2277_v47 = vpop.f32.mrf.mxu0  ;;  %v2305_v59 = vpop.f32.mrf.mxu1 }
 0x197   : > { %v2278_v21 = vadd.f32 %v2277_v47, %v2276_v43  ;;  %v2306_v9 = vadd.f32 %v2305_v59, %v2304_v52  ;;  %v1168_v56 = vadd.f32 %v1164_v15, %v805_v61  ;;  %v1155_v52 = vrot.slane %v1142_v7, %v3085_v36 }
 0x199   : > { %v806_v22 = vmul.f32 %v2278_v21, %v792_v3  ;;  %v1165_v63 = vmul.f32 %v2306_v9, %v1151_v23 }
 0x19a   : > { %v2279_v58 = vpop.f32.mrf.mxu0 }
 0x19b   : > { %v2307_v62 = vpop.f32.mrf.mxu1 }
 0x19c   : > { %v2280_v54 = vpop.f32.mrf.mxu0 }
 0x19d   : > { %v2308_v39 = vpop.f32.mrf.mxu1  ;;  %v2281_v43 = vadd.f32 %v2280_v54, %v2279_v58  ;;  %v1859_v54 = vcombine.high %v1851_v8, %v1851_v8 }
 0x19e   : > { %v2282_v26 = vpop.f32.mrf.mxu0  ;;  %v2309_v47 = vadd.f32 %v2308_v39, %v2307_v62  ;;  %v1169_v62 = vadd.f32 %v1165_v63, %v806_v22 }
 0x19f   : > { %v2310_v51 = vpop.f32.mrf.mxu1  ;;  %v807_v19 = vmul.f32 %v2281_v43, %v796_v10  ;;  %v1872_v3 = vrot.slane %v1859_v54, %v3085_v36 }
 0x1a0   : > { %v2283_v50 = vpop.f32.mrf.mxu0  ;;  %v1166_v29 = vmul.f32 %v2309_v47, %v1155_v52 }
 0x1a1   : > { %v2311_v27 = vpop.f32.mrf.mxu1  ;;  %v2284_v18 = vadd.f32 %v2283_v50, %v2282_v26 }
 0x1a2   : > { %v2312_v39 = vadd.f32 %v2311_v27, %v2310_v51  ;;  %v1170_v21 = vadd.f32 %v1166_v29, %v807_v19 }
 0x1a3   : > { %v808_v20 = vmul.f32 %v2284_v18, %v800_v33 }
 0x1a4   : > { %v1167_v9 = vmul.f32 %v2312_v39, %v1159_v24 }
 0x1a6   : > { %v1171_v8 = vadd.f32 %v1167_v9, %v808_v20 }
 0x1be   : > { %v2329_v16 = vpop.f32.mrf.mxu0 }
 0x1c0   : > { %v2330_v14 = vpop.f32.mrf.mxu0 }
 0x1c1   : > { %v2331_v35 = vadd.f32 %v2330_v14, %v2329_v16  ;;  %v1860_v16 = vcombine.high %v1858_v34, %v1858_v34 }
 0x1c2   : > { %v2332_v28 = vpop.f32.mrf.mxu0 }
 0x1c3   : > { %v2357_v48 = vpop.f32.mrf.mxu1  ;;  %v1522_v44 = vmul.f32 %v2331_v35, %v1505_v42  ;;  %v1876_v27 = vrot.slane %v1860_v16, %v3085_v36 }
 0x1c4   : > { %v2333_v46 = vpop.f32.mrf.mxu0 }
 0x1c5   : > { %v2358_v60 = vpop.f32.mrf.mxu1  ;;  %v2334_v59 = vadd.f32 %v2333_v46, %v2332_v28  ;;  %v1526_v2 = vadd.f32 %v1522_v44, %v1168_v56 }
 0x1c6   : > { %v2359_v38 = vadd.f32 %v2358_v60, %v2357_v48  ;;  %v2335_v58 = vpop.f32.mrf.mxu0 }
 0x1c7   : > { %v2360_v30 = vpop.f32.mrf.mxu1  ;;  %v1523_v41 = vmul.f32 %v2334_v59, %v1509_v49 }
 0x1c8   : > { %v1881_v11 = vmul.f32 %v2359_v38, %v1864_v55  ;;  %v2336_v25 = vpop.f32.mrf.mxu0 }
 0x1c9   : > { %v2361_v12 = vpop.f32.mrf.mxu1  ;;  %v2337_v37 = vadd.f32 %v2336_v25, %v2335_v58  ;;  %v1527_v17 = vadd.f32 %v1523_v41, %v1169_v62 }
 0x1ca   : > { %v1885_v6 = vadd.f32 %v1881_v11, %v1526_v2  ;;  %v2362_v13 = vadd.f32 %v2361_v12, %v2360_v30  ;;  %v2338_v40 = vpop.f32.mrf.mxu0 }
 0x1cb   : > { %v2363_v45 = vpop.f32.mrf.mxu1  ;;  %v1524_v0 = vmul.f32 %v2337_v37, %v1513_v53 }
 0x1cc   : > { %v1882_v26 = vmul.f32 %v2362_v13, %v1868_v1  ;;  %v2339_v50 = vpop.f32.mrf.mxu0 }
 0x1cd   : > { %v2364_v51 = vpop.f32.mrf.mxu1  ;;  %v2340_v23 = vadd.f32 %v2339_v50, %v2338_v40  ;;  %v1528_v61 = vadd.f32 %v1524_v0, %v1170_v21 }
 0x1ce   : > { %v1886_v42 = vadd.f32 %v1882_v26, %v1527_v17  ;;  %v2365_v15 = vadd.f32 %v2364_v51, %v2363_v45 }
 0x1cf   : > { %v2366_v7 = vpop.f32.mrf.mxu1  ;;  %v1525_v14 = vmul.f32 %v2340_v23, %v1517_v4 }
 0x1d0   : > { %v1883_v32 = vmul.f32 %v2365_v15, %v1872_v3 }
 0x1d1   : > { %v2367_v5 = vpop.f32.mrf.mxu1  ;;  %v1529_v34 = vadd.f32 %v1525_v14, %v1171_v8 }
 0x1d2   : > { %v1887_v35 = vadd.f32 %v1883_v32, %v1528_v61  ;;  %v2368_v10 = vadd.f32 %v2367_v5, %v2366_v7  ;;  %1892 = sbr.rel (%p2242_p13) target bundleno = 473 (0x1d9), region = 64 }
 0x1d4   : > { %v1884_v28 = vmul.f32 %v2368_v10, %v1876_v27 }
 0x1d6   : > { %v1888_v49 = vadd.f32 %v1884_v28, %v1529_v34 }
 0x1d7   : > { %1893 = vst [vmem:[#allocation2 + $0x10] sm:$0xff] %v1885_v6  ;;  %1894 = vst [vmem:[#allocation2] sm:$0xff] %v1886_v42 }
 0x1d8   : > { %1895 = vst [vmem:[#allocation2 + $0x18] sm:$0xff] %v1887_v35  ;;  %1896 = vst [vmem:[#allocation2 + $0x8] sm:$0xff] %v1888_v49 }
 0x1d9 PF: > { %s3705_s5 = sld [smem:[#allocation19_spill]] }
 0x1df   : > { %p2243_p8 = scmp.le.s32.totalorder %s3705_s5, 0 }
 0x1e1   : > { %1900 = sbr.rel (%p2243_p8) target bundleno = 491 (0x1eb), region = 68 }
 0x1e6   : > { %v1901_v36 = vld [vmem:[#allocation2 + $0x10] sm:$0xff]  ;;  %v1902_v31 = vld [vmem:[#allocation2] sm:$0xff]  ;;  %v1903_v22 = vld [vmem:[#allocation2 + $0x18] sm:$0xff] }
 0x1e7   : > { %v1905_v63 = vadd.f32 %v1901_v36, %v1885_v6  ;;  %v1906_v43 = vadd.f32 %v1902_v31, %v1886_v42  ;;  %v1907_v48 = vadd.f32 %v1903_v22, %v1887_v35  ;;  %v1904_v44 = vld [vmem:[#allocation2 + $0x8] sm:$0xff] }
 0x1e8   : > { %v1908_v56 = vadd.f32 %v1904_v44, %v1888_v49 }
 0x1e9   : > { %1909 = vst [vmem:[#allocation2 + $0x10] sm:$0xff] %v1905_v63  ;;  %1910 = vst [vmem:[#allocation2] sm:$0xff] %v1906_v43 }
 0x1ea   : > { %1911 = vst [vmem:[#allocation2 + $0x18] sm:$0xff] %v1907_v48  ;;  %1912 = vst [vmem:[#allocation2 + $0x8] sm:$0xff] %v1908_v56 }
 0x1eb PF: > { %s3706_s16 = sld [smem:[#allocation19_spill]] }
 0x1f1   : > { %p2244_p3 = scmp.ne.s32.totalorder %s3706_s16, 2 }
 0x1f2   : > { %s3707_s1 = sld [smem:[#allocation27_spill]] (!%p2244_p3) }
 0x1f3   : > { %1916 = sbr.rel (%p2244_p3) target bundleno = 719 (0x2cf), region = 72  ;;  %s3708_s10 = sld [smem:[#allocation28_spill]] (!%p2244_p3) }
 0x1f8   : > { %v1923_v47 = vld [vmem:[#allocation2 + $0x18] sm:$0xff]  ;;  %v1924_v52 = vld [vmem:[#allocation2 + $0x8] sm:$0xff]  ;;  %v1921_v55 = vld [vmem:[#allocation2 + $0x10] sm:$0xff]  ;;  %vm1961_vm0 = vcmask 261120   ;;  %v2776_v24 = vmov 0  }
 0x1f9   : > { %v1926_v46 = vpack.c.bf16 %v1924_v52, %v1923_v47  ;;  %v1922_v33 = vld [vmem:[#allocation2] sm:$0xff]  ;;  %2518 = vset.pattern.permute.xlu1 %v2776_v24  ;;  %2517 = vset.pattern.permute.xlu0 %v2776_v24  ;;  %v1929_v1 = vld [vmem:[%s3708_s10 + $0x10] sm:$0xff]  ;;  %v1930_v38 = vld [vmem:[%s3708_s10 + $0x18] sm:$0xff] }
 0x1fa   : > { %v1925_v60 = vpack.c.bf16 %v1922_v33, %v1921_v55  ;;  %v2519_v59 = vld [vmem:[%s3707_s1] sm:$0xff]   ;;  %1943 = vperm.xlu1 %2518, %v1929_v1   ;;  %v2520_v58 = vld [vmem:[%s3707_s1 + $0x8] sm:$0xff]   ;;  %v2019_v30 = vld [vmem:[%s3028_s18 + $0x10] sm:$0xff] }
 0x1fb   : > { %2373 = vmatprep.subr.bf16.mxu0 %v1926_v46  ;;  %v1927_v2 = vld [vmem:[%s3708_s10] sm:$0xff]  ;;  %2377 = vmatprep.mubr.msk.bf16.mxu0 %vm1961_vm0, %v2519_v59  ;;  %v1928_v53 = vld [vmem:[%s3708_s10 + $0x8] sm:$0xff]  ;;  %v2020_v12 = vld [vmem:[%s3028_s18 + $0x18] sm:$0xff] }
 0x1fc   : > { %2374 = vmatpush3.bf16.msra.mxu0 %v1926_v46  ;;  %1933 = vperm.xlu0 %2517, %v1927_v2   ;;  %v2017_v29 = vld [vmem:[%s3028_s18] sm:$0xff]  ;;  %v2018_v40 = vld [vmem:[%s3028_s18 + $0x8] sm:$0xff] }
 0x1fd   : > { %2375 = vmatprep.subr.bf16.mxu0 %v1925_v60 }
 0x1fe   : > { %1948 = vperm.xlu1 %2518, %v1930_v38  }
 0x200   : > { %2376 = vmatpush3.bf16.msra.mxu0 %v1925_v60  ;;  %1938 = vperm.xlu0 %2517, %v1928_v53  }
 0x203   : > { %2378 = vmatmul.mubr.msk.bf16.vlgmr.msra.gmra.mxu0 %vm1961_vm0, %v2520_v58 }
 0x275   : > { %v1944_v54 = vpop.permute.xlu1 %1943 }
 0x277   : > { %v1934_v62 = vpop.permute.xlu0 %1933 }
 0x279   : > { %v1949_v11 = vpop.permute.xlu1 %1948 }
 0x27b   : > { %v1939_v17 = vpop.permute.xlu0 %1938 }
 0x2c3   : > { %v2379_v19 = vpop.f32.mrf.mxu0 }
 0x2c4   : > { %v2011_v41 = vadd.f32 %v2379_v19, %v1944_v54 }
 0x2c5   : > { %v2002_v57 = vpop.f32.mrf.mxu0 }
 0x2c6   : > { %v2023_v18 = vadd.f32 %v2019_v30, %v2011_v41  ;;  %v2003_v39 = vadd.f32 %v2002_v57, %v1934_v62 }
 0x2c7   : > { %v2380_v25 = vpop.f32.mrf.mxu0 }
 0x2c8   : > { %2027 = vst [vmem:[%s3553_s12 + $0x10] sm:$0xff] %v2023_v18  ;;  %v2021_v37 = vadd.f32 %v2017_v29, %v2003_v39  ;;  %v2014_v6 = vadd.f32 %v2380_v25, %v1949_v11 }
 0x2c9   : > { %v2005_v13 = vpop.f32.mrf.mxu0 }
 0x2ca   : > { %2025 = vst [vmem:[%s3553_s12] sm:$0xff] %v2021_v37  ;;  %v2024_v45 = vadd.f32 %v2020_v12, %v2014_v6  ;;  %v2006_v0 = vadd.f32 %v2005_v13, %v1939_v17 }
 0x2cc   : > { %2028 = vst [vmem:[%s3553_s12 + $0x18] sm:$0xff] %v2024_v45  ;;  %v2022_v3 = vadd.f32 %v2018_v40, %v2006_v0 }
 0x2ce   : > { %2026 = vst [vmem:[%s3553_s12 + $0x8] sm:$0xff] %v2022_v3 }
 0x2cf PF: > { %s3709_s0 = sld [smem:[#allocation20_spill]]  ;;  %s2044_s20 = sshll.u32 %s3553_s12, 4  ;;  %s3593_s20 = int_to_ptr.vmem [resolvable:$true] %s2044_s20 }
 0x2d0   : > { %s3711_s13 = sld [smem:[#allocation29_spill]]  ;;  %s2030_s18 = scalar_lea.sflag [#allocation5], %s3022_s15 }
 0x2d1   : > { %s2633_s11 = scalar_lea.vmem %s3593_s20, 512  ;;  %s2777_s17 = smov [#allocation11]  }
 0x2d2   : > { %p2634_p5 = scmp.ne.s32.totalorder %s3593_s20, %s2633_s11  ;;  %s2637_s22 = sshll.u32 %s2777_s17, 4  ;;  %s2638_s22 = int_to_ptr.vmem [resolvable:$false] %s2637_s22 }
 0x2d3   : > { %s2639_s8 = scalar_lea.vmem %s2638_s22, 1024  ;;  %p2640_p0 = scmp.lt.s32.totalorder %s3593_s20, %s2638_s22 }
 0x2d4   : > { %p2635_p1 = pnand %p2634_p5, %p2883_p6  ;;  %p2641_p11 = scmp.lt.s32.totalorder %s2639_s8, %s2633_s11 }
 0x2d5   : > { %s2256_s16 = sshll.u32 %s3709_s0, 9 }
 0x2d6   : > { %s3590_s19 = scalar_lea.hbm %s3711_s13, %s2256_s16  ;;  %p2636_p9 = pneg %p2635_p1 }
 0x2d7   : > { %p2642_p10 = por %p2641_p11, %p2640_p0 }
 0x2d9   : > { %p2643_p2 = pnand %p2642_p10, %p2636_p9 }
 0x2db   : > { %2646 = shalt.err (!%p2643_p2)
}
 0x2dc   : > { %s2647_s12 = scalar_lea.hbm %s3590_s19, 512  ;;  %s2651_s4 = scalar_lea.hbm %s3711_s13, 1024 }
 0x2dd   : > { %p2648_p4 = scmp.ne.s32.totalorder %s3590_s19, %s2647_s12  ;;  %p2652_p8 = scmp.lt.s32.totalorder %s3590_s19, %s3711_s13 }
 0x2de   : > { %p2653_p3 = scmp.lt.s32.totalorder %s2651_s4, %s2647_s12 }
 0x2df   : > { %p2649_p12 = pnand %p2648_p4, %p2883_p6 }
 0x2e0   : > { %p2654_p5 = por %p2653_p3, %p2652_p8 }
 0x2e1   : > { %p2650_p13 = pneg %p2649_p12 }
 0x2e3   : > { %p2655_p1 = pnand %p2654_p5, %p2650_p13 }
 0x2e5   : > { %2658 = shalt.err (!%p2655_p1)
}
 0x2e6   : > { %s2778_s6 = smov 128   ;;  %s2779_s28 = smov 8  }
 0x2e7   : > { %2394 = dma.vmem_to_hbm [thread:$0]  (%p2883_p6), %s3593_s20, 512, %s3590_s19, %s2030_s18, %s2778_s6, %s2778_s6, %s2779_s28  }
 0x2e8 PF: > { %s3712_s11 = sld [smem:[#allocation18_spill]]  ;;  %p2414_p9 = scmp.ge.s32.totalorder %s2765_s7, 2 }
 0x2ea   : > { %p2410_p0 = pnand %p2414_p9, %p2890_p7 }
 0x2ec   : > { %p2411_p11 = pneg %p2410_p0 }
 0x2ee   : > { %s2059_s22 = sand.u32 1, %s3712_s11  }
 0x2ef   : > { %s2060_s8 = scalar_lea.sflag [#allocation5], %s2059_s22 }
 0x2f0   : > { %2720 = dma.done.wait (%p2411_p11), %s2060_s8, 512  }
 0x2f1   : > { %2722 = vsyncadd (%p2411_p11), %s2060_s8, 4294966784  ;;  %s28_s7 = sadd.s32 1, %s2765_s7   ;;  %s3714_s12 = sld [smem:[#allocation17_spill]] }
 0x2f2   : > { %p25_p10 = scmp.ge.s32.totalorder %s28_s7, 8   ;;  %s3715_s5 = smov %s2985_s21 }
 0x2f3   : > { %s3716_s15 = sld [smem:[#allocation23_spill]]  ;;  %s3717_s19 = smov %s3733_s27 }
 0x2f4   : > { %s3719_s22 = smov %s2733_s23  ;;  %s3720_s23 = smov %s3715_s5 }
 0x2f5   : > { %s3721_s24 = smov %s2741_s25  ;;  %s3722_s25 = smov %s2745_s26 }
 0x2f6   : > { %s3723_s26 = smov %s2982_s9  ;;  %s3724_s27 = smov %s2757_s29 }
 0x2f7   : > { %s3718_s21 = smov %s3714_s12  ;;  %s3725_s28 = smov %s2761_s30 }
 0x2f8   : > { %s3727_s30 = smov %s3717_s19  ;;  %27 = sbr.rel (!%p25_p10) target bundleno = 19 (0x13), region = 139 }
 0x2f9   : > { %s3726_s29 = smov %s3716_s15 }
 0x2fd   :  { %2065 = vsyncpa [#allocation4], 1 }
 0x2fe   :  { %2067 = vsyncpa [#allocation4 + $0x1], 1 }
 0x2ff   :  { %2068 = vsyncpa [#allocation7], 1 }
 0x300   :  { %2070 = vsyncpa [#allocation7 + $0x1], 1 }
 0x301   :  { %2071 = vsyncpa [#allocation10], 1 }
 0x302   :  { %2073 = vsyncpa [#allocation10 + $0x1], 1 }
 0x303   :  { %2074 = vsyncpa [#allocation5], 1 }
 0x304   :  { %2076 = vsyncpa [#allocation5 + $0x1], 1 }

</bundles_post_ra>
